<compile_context>
chip_gen: v7x
topology: tpu7x:2x2x1
jax: 0.10.0
libtpu: 0.0.40
codegen_flags: <defaults>
</compile_context>

<pallas_src>
import functools

import numpy as np
import jax
import jax.numpy as jnp
from jax.experimental import pallas as pl
from jax.experimental.pallas import tpu as pltpu


# 3x3 conv taps, order matches the weight repack below (s = (dy+1)*3 + (dx+1)).
_TAPS = tuple((dy, dx) for dy in (-1, 0, 1) for dx in (-1, 0, 1))


# ----------------------------------------------------------------------------
# Fused Pallas kernel
#   inputs : x_flat (C, M1), w1 (9, O1, C), b1 (O1,1), mask1 (9,1,M1),
#            w2 (9, O2, O1), b2 (O2,1), mask2 (9,1,M2), sel (M1, M2)
#   outputs: conv1 (O1,M1), relu1 (O1,M1), pool (O1,M2), conv2 (O2,M2), relu2 (O2,M2)
#   scratch: zero-padded flat activation buffers used to realize the 3x3 shifts.
# ----------------------------------------------------------------------------
def _fused_kernel(x_ref, w1_ref, b1_ref, m1_ref, w2_ref, b2_ref, m2_ref, sel_ref,
                  y1_ref, r1_ref, p_ref, y2_ref, r2_ref,
                  pad1_ref, padp_ref, pad2_ref, *, W1, W2):
    C, M1 = x_ref.shape
    O1 = w1_ref.shape[1]
    O2 = w2_ref.shape[1]
    M2 = sel_ref.shape[1]
    P1 = (pad1_ref.shape[1] - M1) // 2
    P2 = (pad2_ref.shape[1] - M2) // 2

    # ---- conv1: C -> O1, 3x3, padding 1 (lane axis = flattened (n,h,w) = M1) ----
    pad1_ref[...] = jnp.zeros_like(pad1_ref)
    pad1_ref[:, P1:P1 + M1] = x_ref[...]
    acc1 = jnp.zeros((O1, M1), jnp.float32)
    for s, (dy, dx) in enumerate(_TAPS):
        off = dy * W1 + dx
        shifted = pad1_ref[:, P1 + off:P1 + off + M1]            # (C, M1)
        acc1 = acc1 + jnp.dot(w1_ref[s], shifted * m1_ref[s],    # (O1,C)@(C,M1) on MXU
                              preferred_element_type=jnp.float32)
    y1 = acc1 + b1_ref[...]                                      # bias broadcast over lanes
    y1_ref[...] = y1

    # ---- relu1 ----
    r1 = jnp.maximum(y1, 0.0)
    r1_ref[...] = r1

    # ---- 2x2 max-pool: window max via shifted copies, downsample via 0/1 select GEMM ----
    padp_ref[...] = jnp.zeros_like(padp_ref)
    padp_ref[:, 0:M1] = r1
    mwin = jnp.maximum(
        jnp.maximum(r1, padp_ref[:, 1:1 + M1]),
        jnp.maximum(padp_ref[:, W1:W1 + M1], padp_ref[:, W1 + 1:W1 + 1 + M1]))
    p = jnp.dot(mwin, sel_ref[...], preferred_element_type=jnp.float32)   # (O1, M2)
    p_ref[...] = p

    # ---- conv2: O1 -> O2, 3x3, padding 1 (on the pooled grid, lane axis = M2) ----
    pad2_ref[...] = jnp.zeros_like(pad2_ref)
    pad2_ref[:, P2:P2 + M2] = p
    acc2 = jnp.zeros((O2, M2), jnp.float32)
    for s, (dy, dx) in enumerate(_TAPS):
        off = dy * W2 + dx
        shifted = pad2_ref[:, P2 + off:P2 + off + M2]            # (O1, M2)
        acc2 = acc2 + jnp.dot(w2_ref[s], shifted * m2_ref[s],
                              preferred_element_type=jnp.float32)
    y2 = acc2 + b2_ref[...]
    y2_ref[...] = y2

    # ---- relu2 ----
    r2_ref[...] = jnp.maximum(y2, 0.0)


# ----------------------------------------------------------------------------
# Compile-time constants (numpy, built at trace time under jit)
# ----------------------------------------------------------------------------
def _shift_masks(N, H, W):
    """mask[s, 0, m] = 1 iff the tap (dy,dx) at flat position m stays inside the image
    (this is what emulates the conv zero-padding and prevents row/batch bleed)."""
    M = N * H * W
    h = (np.arange(M) // W) % H
    w = np.arange(M) % W
    masks = np.zeros((9, 1, M), np.float32)
    for s, (dy, dx) in enumerate(_TAPS):
        valid = (h + dy >= 0) & (h + dy < H) & (w + dx >= 0) & (w + dx < W)
        masks[s, 0] = valid.astype(np.float32)
    return jnp.asarray(masks)


def _pool_select(N, H, W):
    """0/1 matrix (M, Mo): column m' picks the flat index of the top-left element of
    its 2x2 window (applied to the window-max array)."""
    Ho, Wo = H // 2, W // 2
    M, Mo = N * H * W, N * Ho * Wo
    sel = np.zeros((M, Mo), np.float32)
    mo = np.arange(Mo)
    n, ho, wo = mo // (Ho * Wo), (mo // Wo) % Ho, mo % Wo
    sel[n * H * W + (2 * ho) * W + 2 * wo, mo] = 1.0
    return jnp.asarray(sel)


def _full_block(shape):
    return pl.BlockSpec(shape, lambda: (0,) * len(shape))


def _fused_feature_pipeline(x_flat, w1p, b1c, m1, w2p, b2c, m2, sel, *, W1, W2):
    C, M1 = x_flat.shape
    O1 = w1p.shape[1]
    O2 = w2p.shape[1]
    M2 = sel.shape[1]
    P1, P2 = W1 + 1, W2 + 1          # flat-shift padding (max |offset| = W + 1)

    out_shape = (
        jax.ShapeDtypeStruct((O1, M1), jnp.float32),   # conv1
        jax.ShapeDtypeStruct((O1, M1), jnp.float32),   # relu1
        jax.ShapeDtypeStruct((O1, M2), jnp.float32),   # pool
        jax.ShapeDtypeStruct((O2, M2), jnp.float32),   # conv2
        jax.ShapeDtypeStruct((O2, M2), jnp.float32),   # relu2
    )
    in_specs = [_full_block(a.shape)
                for a in (x_flat, w1p, b1c, m1, w2p, b2c, m2, sel)]
    out_specs = tuple(_full_block(s.shape) for s in out_shape)

    return pl.pallas_call(
        functools.partial(_fused_kernel, W1=W1, W2=W2),
        out_shape=out_shape,
        grid=(),
        in_specs=in_specs,
        out_specs=out_specs,
        scratch_shapes=[
            pltpu.VMEM((C, M1 + 2 * P1), jnp.float32),   # padded conv1 input
            pltpu.VMEM((O1, M1 + P1), jnp.float32),      # padded relu1 (pool shifts)
            pltpu.VMEM((O1, M2 + 2 * P2), jnp.float32),  # padded conv2 input
        ],
    )(x_flat, w1p, b1c, m1, w2p, b2c, m2, sel)


# ----------------------------------------------------------------------------
# Whole forward, jit'ed: one kernel launch, NCHW transpose only at export
# ----------------------------------------------------------------------------
@jax.jit
def _forward_jit(x, w1, b1, w2, b2):
    N, C, H, W = x.shape
    O1, O2 = w1.shape[0], w2.shape[0]
    Ho, Wo = H // 2, W // 2

    # one-time relayout into the kernel's channel-major / flat-spatial layout
    x_flat = jnp.transpose(x, (1, 0, 2, 3)).reshape(C, N * H * W)
    w1p = jnp.transpose(w1, (2, 3, 0, 1)).reshape(9, O1, C)      # [tap, O, C]
    w2p = jnp.transpose(w2, (2, 3, 0, 1)).reshape(9, O2, O1)
    b1c = b1.reshape(O1, 1)
    b2c = b2.reshape(O2, 1)
    m1 = _shift_masks(N, H, W)
    m2 = _shift_masks(N, Ho, Wo)
    sel = _pool_select(N, H, W)

    y1, r1, p, y2, r2 = _fused_feature_pipeline(
        x_flat, w1p, b1c, m1, w2p, b2c, m2, sel, W1=W, W2=Wo)

    def to_nchw(a, c, h, w):
        return a.reshape(c, N, h, w).transpose(1, 0, 2, 3)

    return (to_nchw(y1, O1, H, W), to_nchw(r1, O1, H, W), to_nchw(p, O1, Ho, Wo),
            to_nchw(y2, O2, Ho, Wo), to_nchw(r2, O2, Ho, Wo))


# TODO(synk): FeatureExtractor wraps an *arbitrary* submodule; this implements the
# concrete conv/relu/pool/conv/relu stack — other child-module types would need kernels.
def feature_extractor_forward(x, params):
    """Mirrors FeatureExtractor.forward: apply each child module in order, collect each
    intermediate output as numpy, return (outputs, final_x).  All five layers run in a
    single fused Pallas kernel; one host transfer at the end replaces the per-layer
    `.data.cpu().numpy()` syncs."""
    outs_dev = _forward_jit(x, params["w1"], params["b1"], params["w2"], params["b2"])
    outputs = [np.asarray(o) for o in jax.device_get(outs_dev)]
    return outputs, outs_dev[-1]


# ----------------------------------------------------------------------------
# Deterministic parameters + plain-JAX reference (for a numerical sanity check)
# ----------------------------------------------------------------------------
def make_params(key):
    k1, k2, k3, k4 = jax.random.split(key, 4)
    return {
        "w1": jax.random.normal(k1, (8, 4, 3, 3), jnp.float32) * 0.1,
        "b1": jax.random.normal(k2, (8,), jnp.float32) * 0.1,
        "w2": jax.random.normal(k3, (16, 8, 3, 3), jnp.float32) * 0.1,
        "b2": jax.random.normal(k4, (16,), jnp.float32) * 0.1,
    }


@jax.jit
def _reference_forward(x, w1, b1, w2, b2):
    dn = ("NCHW", "OIHW", "NCHW")
    hp = jax.lax.Precision.HIGHEST
    y1 = jax.lax.conv_general_dilated(x, w1, (1, 1), ((1, 1), (1, 1)),
                                      dimension_numbers=dn, precision=hp)
    y1 = y1 + b1[None, :, None, None]
    r1 = jnp.maximum(y1, 0.0)
    p = jax.lax.reduce_window(r1, -jnp.inf, jax.lax.max,
                              (1, 1, 2, 2), (1, 1, 2, 2), "VALID")
    y2 = jax.lax.conv_general_dilated(p, w2, (1, 1), ((1, 1), (1, 1)),
                                      dimension_numbers=dn, precision=hp)
    y2 = y2 + b2[None, :, None, None]
    r2 = jnp.maximum(y2, 0.0)
    return y1, r1, p, y2, r2


if __name__ == "__main__":
    key = jax.random.PRNGKey(0)
    kx, kp = jax.random.split(key)
    x = jax.random.normal(kx, (2, 4, 16, 16), jnp.float32)   # NCHW, like PyTorch
    params = make_params(kp)

    outputs, final_x = feature_extractor_forward(x, params)
    jax.block_until_ready(final_x)

    expected_shapes = [(2, 8, 16, 16), (2, 8, 16, 16), (2, 8, 8, 8),
                       (2, 16, 8, 8), (2, 16, 8, 8)]
    assert [o.shape for o in outputs] == expected_shapes
    assert final_x.shape == (2, 16, 8, 8)

    # numerical check against a plain-JAX (XLA) reference of the same network
    refs = jax.device_get(_reference_forward(
        x, params["w1"], params["b1"], params["w2"], params["b2"]))
    for name, got, ref in zip(("conv1", "relu1", "pool", "conv2", "relu2"),
                              outputs, refs):
        err = float(np.max(np.abs(got - ref)))
        assert err < 1e-2, f"{name}: max abs err {err}"
    assert float(np.max(np.abs(np.asarray(final_x) - refs[-1]))) < 1e-2

    print("KERNEL_OK")
</pallas_src>

<mosaic_0001>
module attributes {stable_mosaic.version = 11 : i64} {
  func.func @_fused_kernel(%arg0: memref<4x512xf32, #tpu.memory_space<vmem>>, %arg1: memref<9x8x4xf32, #tpu.memory_space<vmem>>, %arg2: memref<8x1xf32, #tpu.memory_space<vmem>>, %arg3: memref<9x1x512xf32, #tpu.memory_space<vmem>>, %arg4: memref<9x16x8xf32, #tpu.memory_space<vmem>>, %arg5: memref<16x1xf32, #tpu.memory_space<vmem>>, %arg6: memref<9x1x128xf32, #tpu.memory_space<vmem>>, %arg7: memref<512x128xf32, #tpu.memory_space<vmem>>, %arg8: memref<8x512xf32, #tpu.memory_space<vmem>>, %arg9: memref<8x512xf32, #tpu.memory_space<vmem>>, %arg10: memref<8x128xf32, #tpu.memory_space<vmem>>, %arg11: memref<16x128xf32, #tpu.memory_space<vmem>>, %arg12: memref<16x128xf32, #tpu.memory_space<vmem>>, %arg13: memref<4x546xf32, #tpu.memory_space<vmem>>, %arg14: memref<8x529xf32, #tpu.memory_space<vmem>>, %arg15: memref<8x146xf32, #tpu.memory_space<vmem>>) attributes {dimension_semantics = [], scalar_prefetch = 0 : i64, scratch_operands = 3 : i64, tpu.core_type = #tpu.core_type<tc>} {
    %cst = arith.constant 0.000000e+00 : f32
    %0 = vector.broadcast %cst : f32 to vector<4x546xf32>
    %c0 = arith.constant 0 : index
    %c0_0 = arith.constant 0 : index
    %1 = vector.load %arg13[%c0, %c0_0] : memref<4x546xf32, #tpu.memory_space<vmem>>, vector<4x546xf32>
    tpu.vector_store %arg13[%c0, %c0_0], %0 {strides = array<i32>} : memref<4x546xf32, #tpu.memory_space<vmem>>, vector<4x546xf32>,
    %c0_1 = arith.constant 0 : index
    %c0_2 = arith.constant 0 : index
    %2 = vector.load %arg0[%c0_1, %c0_2] : memref<4x512xf32, #tpu.memory_space<vmem>>, vector<4x512xf32>
    %c0_3 = arith.constant 0 : index
    %c17 = arith.constant 17 : index
    %3 = vector.load %arg13[%c0_3, %c17] : memref<4x546xf32, #tpu.memory_space<vmem>>, vector<4x512xf32>
    tpu.vector_store %arg13[%c0_3, %c17], %2 {strides = array<i32>} : memref<4x546xf32, #tpu.memory_space<vmem>>, vector<4x512xf32>,
    %cst_4 = arith.constant 0.000000e+00 : f32
    %4 = vector.broadcast %cst_4 : f32 to vector<8x512xf32>
    %c0_5 = arith.constant 0 : index
    %c0_6 = arith.constant 0 : index
    %5 = vector.load %arg13[%c0_5, %c0_6] : memref<4x546xf32, #tpu.memory_space<vmem>>, vector<4x512xf32>
    %c0_7 = arith.constant 0 : index
    %c0_8 = arith.constant 0 : index
    %c0_9 = arith.constant 0 : index
    %6 = vector.load %arg1[%c0_7, %c0_8, %c0_9] : memref<9x8x4xf32, #tpu.memory_space<vmem>>, vector<1x8x4xf32>
    %7 = vector.shape_cast %6 : vector<1x8x4xf32> to vector<8x4xf32>
    %c0_10 = arith.constant 0 : index
    %c0_11 = arith.constant 0 : index
    %c0_12 = arith.constant 0 : index
    %8 = vector.load %arg3[%c0_10, %c0_11, %c0_12] : memref<9x1x512xf32, #tpu.memory_space<vmem>>, vector<1x1x512xf32>
    %9 = vector.shape_cast %8 : vector<1x1x512xf32> to vector<1x512xf32>
    %10 = vector.broadcast %9 : vector<1x512xf32> to vector<4x512xf32>
    %11 = arith.mulf %5, %10 : vector<4x512xf32>
    %cst_13 = arith.constant dense<0.000000e+00> : vector<8x512xf32>
    %12 = tpu.matmul %7, %11, %cst_13 {dimension_numbers = #tpu.dot_dimension_numbers<[1], [0], [0], [1], [0, 0, 1, 1], [], []>} : vector<8x4xf32>, vector<4x512xf32>, vector<8x512xf32> -> vector<8x512xf32>
    %13 = arith.addf %4, %12 : vector<8x512xf32>
    %c0_14 = arith.constant 0 : index
    %c1 = arith.constant 1 : index
    %14 = vector.load %arg13[%c0_14, %c1] : memref<4x546xf32, #tpu.memory_space<vmem>>, vector<4x512xf32>
    %c1_15 = arith.constant 1 : index
    %c0_16 = arith.constant 0 : index
    %c0_17 = arith.constant 0 : index
    %15 = vector.load %arg1[%c1_15, %c0_16, %c0_17] : memref<9x8x4xf32, #tpu.memory_space<vmem>>, vector<1x8x4xf32>
    %16 = vector.shape_cast %15 : vector<1x8x4xf32> to vector<8x4xf32>
    %c1_18 = arith.constant 1 : index
    %c0_19 = arith.constant 0 : index
    %c0_20 = arith.constant 0 : index
    %17 = vector.load %arg3[%c1_18, %c0_19, %c0_20] : memref<9x1x512xf32, #tpu.memory_space<vmem>>, vector<1x1x512xf32>
    %18 = vector.shape_cast %17 : vector<1x1x512xf32> to vector<1x512xf32>
    %19 = vector.broadcast %18 : vector<1x512xf32> to vector<4x512xf32>
    %20 = arith.mulf %14, %19 : vector<4x512xf32>
    %cst_21 = arith.constant dense<0.000000e+00> : vector<8x512xf32>
    %21 = tpu.matmul %16, %20, %cst_21 {dimension_numbers = #tpu.dot_dimension_numbers<[1], [0], [0], [1], [0, 0, 1, 1], [], []>} : vector<8x4xf32>, vector<4x512xf32>, vector<8x512xf32> -> vector<8x512xf32>
    %22 = arith.addf %13, %21 : vector<8x512xf32>
    %c0_22 = arith.constant 0 : index
    %c2 = arith.constant 2 : index
    %23 = vector.load %arg13[%c0_22, %c2] : memref<4x546xf32, #tpu.memory_space<vmem>>, vector<4x512xf32>
    %c2_23 = arith.constant 2 : index
    %c0_24 = arith.constant 0 : index
    %c0_25 = arith.constant 0 : index
    %24 = vector.load %arg1[%c2_23, %c0_24, %c0_25] : memref<9x8x4xf32, #tpu.memory_space<vmem>>, vector<1x8x4xf32>
    %25 = vector.shape_cast %24 : vector<1x8x4xf32> to vector<8x4xf32>
    %c2_26 = arith.constant 2 : index
    %c0_27 = arith.constant 0 : index
    %c0_28 = arith.constant 0 : index
    %26 = vector.load %arg3[%c2_26, %c0_27, %c0_28] : memref<9x1x512xf32, #tpu.memory_space<vmem>>, vector<1x1x512xf32>
    %27 = vector.shape_cast %26 : vector<1x1x512xf32> to vector<1x512xf32>
    %28 = vector.broadcast %27 : vector<1x512xf32> to vector<4x512xf32>
    %29 = arith.mulf %23, %28 : vector<4x512xf32>
    %cst_29 = arith.constant dense<0.000000e+00> : vector<8x512xf32>
    %30 = tpu.matmul %25, %29, %cst_29 {dimension_numbers = #tpu.dot_dimension_numbers<[1], [0], [0], [1], [0, 0, 1, 1], [], []>} : vector<8x4xf32>, vector<4x512xf32>, vector<8x512xf32> -> vector<8x512xf32>
    %31 = arith.addf %22, %30 : vector<8x512xf32>
    %c0_30 = arith.constant 0 : index
    %c16 = arith.constant 16 : index
    %32 = vector.load %arg13[%c0_30, %c16] : memref<4x546xf32, #tpu.memory_space<vmem>>, vector<4x512xf32>
    %c3 = arith.constant 3 : index
    %c0_31 = arith.constant 0 : index
    %c0_32 = arith.constant 0 : index
    %33 = vector.load %arg1[%c3, %c0_31, %c0_32] : memref<9x8x4xf32, #tpu.memory_space<vmem>>, vector<1x8x4xf32>
    %34 = vector.shape_cast %33 : vector<1x8x4xf32> to vector<8x4xf32>
    %c3_33 = arith.constant 3 : index
    %c0_34 = arith.constant 0 : index
    %c0_35 = arith.constant 0 : index
    %35 = vector.load %arg3[%c3_33, %c0_34, %c0_35] : memref<9x1x512xf32, #tpu.memory_space<vmem>>, vector<1x1x512xf32>
    %36 = vector.shape_cast %35 : vector<1x1x512xf32> to vector<1x512xf32>
    %37 = vector.broadcast %36 : vector<1x512xf32> to vector<4x512xf32>
    %38 = arith.mulf %32, %37 : vector<4x512xf32>
    %cst_36 = arith.constant dense<0.000000e+00> : vector<8x512xf32>
    %39 = tpu.matmul %34, %38, %cst_36 {dimension_numbers = #tpu.dot_dimension_numbers<[1], [0], [0], [1], [0, 0, 1, 1], [], []>} : vector<8x4xf32>, vector<4x512xf32>, vector<8x512xf32> -> vector<8x512xf32>
    %40 = arith.addf %31, %39 : vector<8x512xf32>
    %c0_37 = arith.constant 0 : index
    %c17_38 = arith.constant 17 : index
    %41 = vector.load %arg13[%c0_37, %c17_38] : memref<4x546xf32, #tpu.memory_space<vmem>>, vector<4x512xf32>
    %c4 = arith.constant 4 : index
    %c0_39 = arith.constant 0 : index
    %c0_40 = arith.constant 0 : index
    %42 = vector.load %arg1[%c4, %c0_39, %c0_40] : memref<9x8x4xf32, #tpu.memory_space<vmem>>, vector<1x8x4xf32>
    %43 = vector.shape_cast %42 : vector<1x8x4xf32> to vector<8x4xf32>
    %c4_41 = arith.constant 4 : index
    %c0_42 = arith.constant 0 : index
    %c0_43 = arith.constant 0 : index
    %44 = vector.load %arg3[%c4_41, %c0_42, %c0_43] : memref<9x1x512xf32, #tpu.memory_space<vmem>>, vector<1x1x512xf32>
    %45 = vector.shape_cast %44 : vector<1x1x512xf32> to vector<1x512xf32>
    %46 = vector.broadcast %45 : vector<1x512xf32> to vector<4x512xf32>
    %47 = arith.mulf %41, %46 : vector<4x512xf32>
    %cst_44 = arith.constant dense<0.000000e+00> : vector<8x512xf32>
    %48 = tpu.matmul %43, %47, %cst_44 {dimension_numbers = #tpu.dot_dimension_numbers<[1], [0], [0], [1], [0, 0, 1, 1], [], []>} : vector<8x4xf32>, vector<4x512xf32>, vector<8x512xf32> -> vector<8x512xf32>
    %49 = arith.addf %40, %48 : vector<8x512xf32>
    %c0_45 = arith.constant 0 : index
    %c18 = arith.constant 18 : index
    %50 = vector.load %arg13[%c0_45, %c18] : memref<4x546xf32, #tpu.memory_space<vmem>>, vector<4x512xf32>
    %c5 = arith.constant 5 : index
    %c0_46 = arith.constant 0 : index
    %c0_47 = arith.constant 0 : index
    %51 = vector.load %arg1[%c5, %c0_46, %c0_47] : memref<9x8x4xf32, #tpu.memory_space<vmem>>, vector<1x8x4xf32>
    %52 = vector.shape_cast %51 : vector<1x8x4xf32> to vector<8x4xf32>
    %c5_48 = arith.constant 5 : index
    %c0_49 = arith.constant 0 : index
    %c0_50 = arith.constant 0 : index
    %53 = vector.load %arg3[%c5_48, %c0_49, %c0_50] : memref<9x1x512xf32, #tpu.memory_space<vmem>>, vector<1x1x512xf32>
    %54 = vector.shape_cast %53 : vector<1x1x512xf32> to vector<1x512xf32>
    %55 = vector.broadcast %54 : vector<1x512xf32> to vector<4x512xf32>
    %56 = arith.mulf %50, %55 : vector<4x512xf32>
    %cst_51 = arith.constant dense<0.000000e+00> : vector<8x512xf32>
    %57 = tpu.matmul %52, %56, %cst_51 {dimension_numbers = #tpu.dot_dimension_numbers<[1], [0], [0], [1], [0, 0, 1, 1], [], []>} : vector<8x4xf32>, vector<4x512xf32>, vector<8x512xf32> -> vector<8x512xf32>
    %58 = arith.addf %49, %57 : vector<8x512xf32>
    %c0_52 = arith.constant 0 : index
    %c32 = arith.constant 32 : index
    %59 = vector.load %arg13[%c0_52, %c32] : memref<4x546xf32, #tpu.memory_space<vmem>>, vector<4x512xf32>
    %c6 = arith.constant 6 : index
    %c0_53 = arith.constant 0 : index
    %c0_54 = arith.constant 0 : index
    %60 = vector.load %arg1[%c6, %c0_53, %c0_54] : memref<9x8x4xf32, #tpu.memory_space<vmem>>, vector<1x8x4xf32>
    %61 = vector.shape_cast %60 : vector<1x8x4xf32> to vector<8x4xf32>
    %c6_55 = arith.constant 6 : index
    %c0_56 = arith.constant 0 : index
    %c0_57 = arith.constant 0 : index
    %62 = vector.load %arg3[%c6_55, %c0_56, %c0_57] : memref<9x1x512xf32, #tpu.memory_space<vmem>>, vector<1x1x512xf32>
    %63 = vector.shape_cast %62 : vector<1x1x512xf32> to vector<1x512xf32>
    %64 = vector.broadcast %63 : vector<1x512xf32> to vector<4x512xf32>
    %65 = arith.mulf %59, %64 : vector<4x512xf32>
    %cst_58 = arith.constant dense<0.000000e+00> : vector<8x512xf32>
    %66 = tpu.matmul %61, %65, %cst_58 {dimension_numbers = #tpu.dot_dimension_numbers<[1], [0], [0], [1], [0, 0, 1, 1], [], []>} : vector<8x4xf32>, vector<4x512xf32>, vector<8x512xf32> -> vector<8x512xf32>
    %67 = arith.addf %58, %66 : vector<8x512xf32>
    %c0_59 = arith.constant 0 : index
    %c33 = arith.constant 33 : index
    %68 = vector.load %arg13[%c0_59, %c33] : memref<4x546xf32, #tpu.memory_space<vmem>>, vector<4x512xf32>
    %c7 = arith.constant 7 : index
    %c0_60 = arith.constant 0 : index
    %c0_61 = arith.constant 0 : index
    %69 = vector.load %arg1[%c7, %c0_60, %c0_61] : memref<9x8x4xf32, #tpu.memory_space<vmem>>, vector<1x8x4xf32>
    %70 = vector.shape_cast %69 : vector<1x8x4xf32> to vector<8x4xf32>
    %c7_62 = arith.constant 7 : index
    %c0_63 = arith.constant 0 : index
    %c0_64 = arith.constant 0 : index
    %71 = vector.load %arg3[%c7_62, %c0_63, %c0_64] : memref<9x1x512xf32, #tpu.memory_space<vmem>>, vector<1x1x512xf32>
    %72 = vector.shape_cast %71 : vector<1x1x512xf32> to vector<1x512xf32>
    %73 = vector.broadcast %72 : vector<1x512xf32> to vector<4x512xf32>
    %74 = arith.mulf %68, %73 : vector<4x512xf32>
    %cst_65 = arith.constant dense<0.000000e+00> : vector<8x512xf32>
    %75 = tpu.matmul %70, %74, %cst_65 {dimension_numbers = #tpu.dot_dimension_numbers<[1], [0], [0], [1], [0, 0, 1, 1], [], []>} : vector<8x4xf32>, vector<4x512xf32>, vector<8x512xf32> -> vector<8x512xf32>
    %76 = arith.addf %67, %75 : vector<8x512xf32>
    %c0_66 = arith.constant 0 : index
    %c34 = arith.constant 34 : index
    %77 = vector.load %arg13[%c0_66, %c34] : memref<4x546xf32, #tpu.memory_space<vmem>>, vector<4x512xf32>
    %c8 = arith.constant 8 : index
    %c0_67 = arith.constant 0 : index
    %c0_68 = arith.constant 0 : index
    %78 = vector.load %arg1[%c8, %c0_67, %c0_68] : memref<9x8x4xf32, #tpu.memory_space<vmem>>, vector<1x8x4xf32>
    %79 = vector.shape_cast %78 : vector<1x8x4xf32> to vector<8x4xf32>
    %c8_69 = arith.constant 8 : index
    %c0_70 = arith.constant 0 : index
    %c0_71 = arith.constant 0 : index
    %80 = vector.load %arg3[%c8_69, %c0_70, %c0_71] : memref<9x1x512xf32, #tpu.memory_space<vmem>>, vector<1x1x512xf32>
    %81 = vector.shape_cast %80 : vector<1x1x512xf32> to vector<1x512xf32>
    %82 = vector.broadcast %81 : vector<1x512xf32> to vector<4x512xf32>
    %83 = arith.mulf %77, %82 : vector<4x512xf32>
    %cst_72 = arith.constant dense<0.000000e+00> : vector<8x512xf32>
    %84 = tpu.matmul %79, %83, %cst_72 {dimension_numbers = #tpu.dot_dimension_numbers<[1], [0], [0], [1], [0, 0, 1, 1], [], []>} : vector<8x4xf32>, vector<4x512xf32>, vector<8x512xf32> -> vector<8x512xf32>
    %85 = arith.addf %76, %84 : vector<8x512xf32>
    %c0_73 = arith.constant 0 : index
    %c0_74 = arith.constant 0 : index
    %86 = vector.load %arg2[%c0_73, %c0_74] : memref<8x1xf32, #tpu.memory_space<vmem>>, vector<8x1xf32>
    %87 = vector.broadcast %86 : vector<8x1xf32> to vector<8x512xf32>
    %88 = arith.addf %85, %87 : vector<8x512xf32>
    %c0_75 = arith.constant 0 : index
    %c0_76 = arith.constant 0 : index
    %89 = vector.load %arg8[%c0_75, %c0_76] : memref<8x512xf32, #tpu.memory_space<vmem>>, vector<8x512xf32>
    tpu.vector_store %arg8[%c0_75, %c0_76], %88 {strides = array<i32>} : memref<8x512xf32, #tpu.memory_space<vmem>>, vector<8x512xf32>,
    %cst_77 = arith.constant 0.000000e+00 : f32
    %90 = vector.broadcast %cst_77 : f32 to vector<8x512xf32>
    %91 = arith.maximumf %88, %90 : vector<8x512xf32>
    %c0_78 = arith.constant 0 : index
    %c0_79 = arith.constant 0 : index
    %92 = vector.load %arg9[%c0_78, %c0_79] : memref<8x512xf32, #tpu.memory_space<vmem>>, vector<8x512xf32>
    tpu.vector_store %arg9[%c0_78, %c0_79], %91 {strides = array<i32>} : memref<8x512xf32, #tpu.memory_space<vmem>>, vector<8x512xf32>,
    %cst_80 = arith.constant 0.000000e+00 : f32
    %93 = vector.broadcast %cst_80 : f32 to vector<8x529xf32>
    %c0_81 = arith.constant 0 : index
    %c0_82 = arith.constant 0 : index
    %94 = vector.load %arg14[%c0_81, %c0_82] : memref<8x529xf32, #tpu.memory_space<vmem>>, vector<8x529xf32>
    tpu.vector_store %arg14[%c0_81, %c0_82], %93 {strides = array<i32>} : memref<8x529xf32, #tpu.memory_space<vmem>>, vector<8x529xf32>,
    %c0_83 = arith.constant 0 : index
    %c0_84 = arith.constant 0 : index
    %95 = vector.load %arg14[%c0_83, %c0_84] : memref<8x529xf32, #tpu.memory_space<vmem>>, vector<8x512xf32>
    tpu.vector_store %arg14[%c0_83, %c0_84], %91 {strides = array<i32>} : memref<8x529xf32, #tpu.memory_space<vmem>>, vector<8x512xf32>,
    %c0_85 = arith.constant 0 : index
    %c1_86 = arith.constant 1 : index
    %96 = vector.load %arg14[%c0_85, %c1_86] : memref<8x529xf32, #tpu.memory_space<vmem>>, vector<8x512xf32>
    %97 = arith.maximumf %91, %96 : vector<8x512xf32>
    %c0_87 = arith.constant 0 : index
    %c16_88 = arith.constant 16 : index
    %98 = vector.load %arg14[%c0_87, %c16_88] : memref<8x529xf32, #tpu.memory_space<vmem>>, vector<8x512xf32>
    %c0_89 = arith.constant 0 : index
    %c17_90 = arith.constant 17 : index
    %99 = vector.load %arg14[%c0_89, %c17_90] : memref<8x529xf32, #tpu.memory_space<vmem>>, vector<8x512xf32>
    %100 = arith.maximumf %98, %99 : vector<8x512xf32>
    %101 = arith.maximumf %97, %100 : vector<8x512xf32>
    %c0_91 = arith.constant 0 : index
    %c0_92 = arith.constant 0 : index
    %102 = vector.load %arg7[%c0_91, %c0_92] : memref<512x128xf32, #tpu.memory_space<vmem>>, vector<512x128xf32>
    %cst_93 = arith.constant dense<0.000000e+00> : vector<8x128xf32>
    %103 = tpu.matmul %101, %102, %cst_93 {dimension_numbers = #tpu.dot_dimension_numbers<[1], [0], [0], [1], [0, 0, 1, 1], [], []>} : vector<8x512xf32>, vector<512x128xf32>, vector<8x128xf32> -> vector<8x128xf32>
    %c0_94 = arith.constant 0 : index
    %c0_95 = arith.constant 0 : index
    %104 = vector.load %arg10[%c0_94, %c0_95] : memref<8x128xf32, #tpu.memory_space<vmem>>, vector<8x128xf32>
    tpu.vector_store %arg10[%c0_94, %c0_95], %103 {strides = array<i32>} : memref<8x128xf32, #tpu.memory_space<vmem>>, vector<8x128xf32>,
    %cst_96 = arith.constant 0.000000e+00 : f32
    %105 = vector.broadcast %cst_96 : f32 to vector<8x146xf32>
    %c0_97 = arith.constant 0 : index
    %c0_98 = arith.constant 0 : index
    %106 = vector.load %arg15[%c0_97, %c0_98] : memref<8x146xf32, #tpu.memory_space<vmem>>, vector<8x146xf32>
    tpu.vector_store %arg15[%c0_97, %c0_98], %105 {strides = array<i32>} : memref<8x146xf32, #tpu.memory_space<vmem>>, vector<8x146xf32>,
    %c0_99 = arith.constant 0 : index
    %c9 = arith.constant 9 : index
    %107 = vector.load %arg15[%c0_99, %c9] : memref<8x146xf32, #tpu.memory_space<vmem>>, vector<8x128xf32>
    tpu.vector_store %arg15[%c0_99, %c9], %103 {strides = array<i32>} : memref<8x146xf32, #tpu.memory_space<vmem>>, vector<8x128xf32>,
    %cst_100 = arith.constant 0.000000e+00 : f32
    %108 = vector.broadcast %cst_100 : f32 to vector<16x128xf32>
    %c0_101 = arith.constant 0 : index
    %c0_102 = arith.constant 0 : index
    %109 = vector.load %arg15[%c0_101, %c0_102] : memref<8x146xf32, #tpu.memory_space<vmem>>, vector<8x128xf32>
    %c0_103 = arith.constant 0 : index
    %c0_104 = arith.constant 0 : index
    %c0_105 = arith.constant 0 : index
    %110 = vector.load %arg4[%c0_103, %c0_104, %c0_105] : memref<9x16x8xf32, #tpu.memory_space<vmem>>, vector<1x16x8xf32>
    %111 = vector.shape_cast %110 : vector<1x16x8xf32> to vector<16x8xf32>
    %c0_106 = arith.constant 0 : index
    %c0_107 = arith.constant 0 : index
    %c0_108 = arith.constant 0 : index
    %112 = vector.load %arg6[%c0_106, %c0_107, %c0_108] : memref<9x1x128xf32, #tpu.memory_space<vmem>>, vector<1x1x128xf32>
    %113 = vector.shape_cast %112 : vector<1x1x128xf32> to vector<1x128xf32>
    %114 = vector.broadcast %113 : vector<1x128xf32> to vector<8x128xf32>
    %115 = arith.mulf %109, %114 : vector<8x128xf32>
    %cst_109 = arith.constant dense<0.000000e+00> : vector<16x128xf32>
    %116 = tpu.matmul %111, %115, %cst_109 {dimension_numbers = #tpu.dot_dimension_numbers<[1], [0], [0], [1], [0, 0, 1, 1], [], []>} : vector<16x8xf32>, vector<8x128xf32>, vector<16x128xf32> -> vector<16x128xf32>
    %117 = arith.addf %108, %116 : vector<16x128xf32>
    %c0_110 = arith.constant 0 : index
    %c1_111 = arith.constant 1 : index
    %118 = vector.load %arg15[%c0_110, %c1_111] : memref<8x146xf32, #tpu.memory_space<vmem>>, vector<8x128xf32>
    %c1_112 = arith.constant 1 : index
    %c0_113 = arith.constant 0 : index
    %c0_114 = arith.constant 0 : index
    %119 = vector.load %arg4[%c1_112, %c0_113, %c0_114] : memref<9x16x8xf32, #tpu.memory_space<vmem>>, vector<1x16x8xf32>
    %120 = vector.shape_cast %119 : vector<1x16x8xf32> to vector<16x8xf32>
    %c1_115 = arith.constant 1 : index
    %c0_116 = arith.constant 0 : index
    %c0_117 = arith.constant 0 : index
    %121 = vector.load %arg6[%c1_115, %c0_116, %c0_117] : memref<9x1x128xf32, #tpu.memory_space<vmem>>, vector<1x1x128xf32>
    %122 = vector.shape_cast %121 : vector<1x1x128xf32> to vector<1x128xf32>
    %123 = vector.broadcast %122 : vector<1x128xf32> to vector<8x128xf32>
    %124 = arith.mulf %118, %123 : vector<8x128xf32>
    %cst_118 = arith.constant dense<0.000000e+00> : vector<16x128xf32>
    %125 = tpu.matmul %120, %124, %cst_118 {dimension_numbers = #tpu.dot_dimension_numbers<[1], [0], [0], [1], [0, 0, 1, 1], [], []>} : vector<16x8xf32>, vector<8x128xf32>, vector<16x128xf32> -> vector<16x128xf32>
    %126 = arith.addf %117, %125 : vector<16x128xf32>
    %c0_119 = arith.constant 0 : index
    %c2_120 = arith.constant 2 : index
    %127 = vector.load %arg15[%c0_119, %c2_120] : memref<8x146xf32, #tpu.memory_space<vmem>>, vector<8x128xf32>
    %c2_121 = arith.constant 2 : index
    %c0_122 = arith.constant 0 : index
    %c0_123 = arith.constant 0 : index
    %128 = vector.load %arg4[%c2_121, %c0_122, %c0_123] : memref<9x16x8xf32, #tpu.memory_space<vmem>>, vector<1x16x8xf32>
    %129 = vector.shape_cast %128 : vector<1x16x8xf32> to vector<16x8xf32>
    %c2_124 = arith.constant 2 : index
    %c0_125 = arith.constant 0 : index
    %c0_126 = arith.constant 0 : index
    %130 = vector.load %arg6[%c2_124, %c0_125, %c0_126] : memref<9x1x128xf32, #tpu.memory_space<vmem>>, vector<1x1x128xf32>
    %131 = vector.shape_cast %130 : vector<1x1x128xf32> to vector<1x128xf32>
    %132 = vector.broadcast %131 : vector<1x128xf32> to vector<8x128xf32>
    %133 = arith.mulf %127, %132 : vector<8x128xf32>
    %cst_127 = arith.constant dense<0.000000e+00> : vector<16x128xf32>
    %134 = tpu.matmul %129, %133, %cst_127 {dimension_numbers = #tpu.dot_dimension_numbers<[1], [0], [0], [1], [0, 0, 1, 1], [], []>} : vector<16x8xf32>, vector<8x128xf32>, vector<16x128xf32> -> vector<16x128xf32>
    %135 = arith.addf %126, %134 : vector<16x128xf32>
    %c0_128 = arith.constant 0 : index
    %c8_129 = arith.constant 8 : index
    %136 = vector.load %arg15[%c0_128, %c8_129] : memref<8x146xf32, #tpu.memory_space<vmem>>, vector<8x128xf32>
    %c3_130 = arith.constant 3 : index
    %c0_131 = arith.constant 0 : index
    %c0_132 = arith.constant 0 : index
    %137 = vector.load %arg4[%c3_130, %c0_131, %c0_132] : memref<9x16x8xf32, #tpu.memory_space<vmem>>, vector<1x16x8xf32>
    %138 = vector.shape_cast %137 : vector<1x16x8xf32> to vector<16x8xf32>
    %c3_133 = arith.constant 3 : index
    %c0_134 = arith.constant 0 : index
    %c0_135 = arith.constant 0 : index
    %139 = vector.load %arg6[%c3_133, %c0_134, %c0_135] : memref<9x1x128xf32, #tpu.memory_space<vmem>>, vector<1x1x128xf32>
    %140 = vector.shape_cast %139 : vector<1x1x128xf32> to vector<1x128xf32>
    %141 = vector.broadcast %140 : vector<1x128xf32> to vector<8x128xf32>
    %142 = arith.mulf %136, %141 : vector<8x128xf32>
    %cst_136 = arith.constant dense<0.000000e+00> : vector<16x128xf32>
    %143 = tpu.matmul %138, %142, %cst_136 {dimension_numbers = #tpu.dot_dimension_numbers<[1], [0], [0], [1], [0, 0, 1, 1], [], []>} : vector<16x8xf32>, vector<8x128xf32>, vector<16x128xf32> -> vector<16x128xf32>
    %144 = arith.addf %135, %143 : vector<16x128xf32>
    %c0_137 = arith.constant 0 : index
    %c9_138 = arith.constant 9 : index
    %145 = vector.load %arg15[%c0_137, %c9_138] : memref<8x146xf32, #tpu.memory_space<vmem>>, vector<8x128xf32>
    %c4_139 = arith.constant 4 : index
    %c0_140 = arith.constant 0 : index
    %c0_141 = arith.constant 0 : index
    %146 = vector.load %arg4[%c4_139, %c0_140, %c0_141] : memref<9x16x8xf32, #tpu.memory_space<vmem>>, vector<1x16x8xf32>
    %147 = vector.shape_cast %146 : vector<1x16x8xf32> to vector<16x8xf32>
    %c4_142 = arith.constant 4 : index
    %c0_143 = arith.constant 0 : index
    %c0_144 = arith.constant 0 : index
    %148 = vector.load %arg6[%c4_142, %c0_143, %c0_144] : memref<9x1x128xf32, #tpu.memory_space<vmem>>, vector<1x1x128xf32>
    %149 = vector.shape_cast %148 : vector<1x1x128xf32> to vector<1x128xf32>
    %150 = vector.broadcast %149 : vector<1x128xf32> to vector<8x128xf32>
    %151 = arith.mulf %145, %150 : vector<8x128xf32>
    %cst_145 = arith.constant dense<0.000000e+00> : vector<16x128xf32>
    %152 = tpu.matmul %147, %151, %cst_145 {dimension_numbers = #tpu.dot_dimension_numbers<[1], [0], [0], [1], [0, 0, 1, 1], [], []>} : vector<16x8xf32>, vector<8x128xf32>, vector<16x128xf32> -> vector<16x128xf32>
    %153 = arith.addf %144, %152 : vector<16x128xf32>
    %c0_146 = arith.constant 0 : index
    %c10 = arith.constant 10 : index
    %154 = vector.load %arg15[%c0_146, %c10] : memref<8x146xf32, #tpu.memory_space<vmem>>, vector<8x128xf32>
    %c5_147 = arith.constant 5 : index
    %c0_148 = arith.constant 0 : index
    %c0_149 = arith.constant 0 : index
    %155 = vector.load %arg4[%c5_147, %c0_148, %c0_149] : memref<9x16x8xf32, #tpu.memory_space<vmem>>, vector<1x16x8xf32>
    %156 = vector.shape_cast %155 : vector<1x16x8xf32> to vector<16x8xf32>
    %c5_150 = arith.constant 5 : index
    %c0_151 = arith.constant 0 : index
    %c0_152 = arith.constant 0 : index
    %157 = vector.load %arg6[%c5_150, %c0_151, %c0_152] : memref<9x1x128xf32, #tpu.memory_space<vmem>>, vector<1x1x128xf32>
    %158 = vector.shape_cast %157 : vector<1x1x128xf32> to vector<1x128xf32>
    %159 = vector.broadcast %158 : vector<1x128xf32> to vector<8x128xf32>
    %160 = arith.mulf %154, %159 : vector<8x128xf32>
    %cst_153 = arith.constant dense<0.000000e+00> : vector<16x128xf32>
    %161 = tpu.matmul %156, %160, %cst_153 {dimension_numbers = #tpu.dot_dimension_numbers<[1], [0], [0], [1], [0, 0, 1, 1], [], []>} : vector<16x8xf32>, vector<8x128xf32>, vector<16x128xf32> -> vector<16x128xf32>
    %162 = arith.addf %153, %161 : vector<16x128xf32>
    %c0_154 = arith.constant 0 : index
    %c16_155 = arith.constant 16 : index
    %163 = vector.load %arg15[%c0_154, %c16_155] : memref<8x146xf32, #tpu.memory_space<vmem>>, vector<8x128xf32>
    %c6_156 = arith.constant 6 : index
    %c0_157 = arith.constant 0 : index
    %c0_158 = arith.constant 0 : index
    %164 = vector.load %arg4[%c6_156, %c0_157, %c0_158] : memref<9x16x8xf32, #tpu.memory_space<vmem>>, vector<1x16x8xf32>
    %165 = vector.shape_cast %164 : vector<1x16x8xf32> to vector<16x8xf32>
    %c6_159 = arith.constant 6 : index
    %c0_160 = arith.constant 0 : index
    %c0_161 = arith.constant 0 : index
    %166 = vector.load %arg6[%c6_159, %c0_160, %c0_161] : memref<9x1x128xf32, #tpu.memory_space<vmem>>, vector<1x1x128xf32>
    %167 = vector.shape_cast %166 : vector<1x1x128xf32> to vector<1x128xf32>
    %168 = vector.broadcast %167 : vector<1x128xf32> to vector<8x128xf32>
    %169 = arith.mulf %163, %168 : vector<8x128xf32>
    %cst_162 = arith.constant dense<0.000000e+00> : vector<16x128xf32>
    %170 = tpu.matmul %165, %169, %cst_162 {dimension_numbers = #tpu.dot_dimension_numbers<[1], [0], [0], [1], [0, 0, 1, 1], [], []>} : vector<16x8xf32>, vector<8x128xf32>, vector<16x128xf32> -> vector<16x128xf32>
    %171 = arith.addf %162, %170 : vector<16x128xf32>
    %c0_163 = arith.constant 0 : index
    %c17_164 = arith.constant 17 : index
    %172 = vector.load %arg15[%c0_163, %c17_164] : memref<8x146xf32, #tpu.memory_space<vmem>>, vector<8x128xf32>
    %c7_165 = arith.constant 7 : index
    %c0_166 = arith.constant 0 : index
    %c0_167 = arith.constant 0 : index
    %173 = vector.load %arg4[%c7_165, %c0_166, %c0_167] : memref<9x16x8xf32, #tpu.memory_space<vmem>>, vector<1x16x8xf32>
    %174 = vector.shape_cast %173 : vector<1x16x8xf32> to vector<16x8xf32>
    %c7_168 = arith.constant 7 : index
    %c0_169 = arith.constant 0 : index
    %c0_170 = arith.constant 0 : index
    %175 = vector.load %arg6[%c7_168, %c0_169, %c0_170] : memref<9x1x128xf32, #tpu.memory_space<vmem>>, vector<1x1x128xf32>
    %176 = vector.shape_cast %175 : vector<1x1x128xf32> to vector<1x128xf32>
    %177 = vector.broadcast %176 : vector<1x128xf32> to vector<8x128xf32>
    %178 = arith.mulf %172, %177 : vector<8x128xf32>
    %cst_171 = arith.constant dense<0.000000e+00> : vector<16x128xf32>
    %179 = tpu.matmul %174, %178, %cst_171 {dimension_numbers = #tpu.dot_dimension_numbers<[1], [0], [0], [1], [0, 0, 1, 1], [], []>} : vector<16x8xf32>, vector<8x128xf32>, vector<16x128xf32> -> vector<16x128xf32>
    %180 = arith.addf %171, %179 : vector<16x128xf32>
    %c0_172 = arith.constant 0 : index
    %c18_173 = arith.constant 18 : index
    %181 = vector.load %arg15[%c0_172, %c18_173] : memref<8x146xf32, #tpu.memory_space<vmem>>, vector<8x128xf32>
    %c8_174 = arith.constant 8 : index
    %c0_175 = arith.constant 0 : index
    %c0_176 = arith.constant 0 : index
    %182 = vector.load %arg4[%c8_174, %c0_175, %c0_176] : memref<9x16x8xf32, #tpu.memory_space<vmem>>, vector<1x16x8xf32>
    %183 = vector.shape_cast %182 : vector<1x16x8xf32> to vector<16x8xf32>
    %c8_177 = arith.constant 8 : index
    %c0_178 = arith.constant 0 : index
    %c0_179 = arith.constant 0 : index
    %184 = vector.load %arg6[%c8_177, %c0_178, %c0_179] : memref<9x1x128xf32, #tpu.memory_space<vmem>>, vector<1x1x128xf32>
    %185 = vector.shape_cast %184 : vector<1x1x128xf32> to vector<1x128xf32>
    %186 = vector.broadcast %185 : vector<1x128xf32> to vector<8x128xf32>
    %187 = arith.mulf %181, %186 : vector<8x128xf32>
    %cst_180 = arith.constant dense<0.000000e+00> : vector<16x128xf32>
    %188 = tpu.matmul %183, %187, %cst_180 {dimension_numbers = #tpu.dot_dimension_numbers<[1], [0], [0], [1], [0, 0, 1, 1], [], []>} : vector<16x8xf32>, vector<8x128xf32>, vector<16x128xf32> -> vector<16x128xf32>
    %189 = arith.addf %180, %188 : vector<16x128xf32>
    %c0_181 = arith.constant 0 : index
    %c0_182 = arith.constant 0 : index
    %190 = vector.load %arg5[%c0_181, %c0_182] : memref<16x1xf32, #tpu.memory_space<vmem>>, vector<16x1xf32>
    %191 = vector.broadcast %190 : vector<16x1xf32> to vector<16x128xf32>
    %192 = arith.addf %189, %191 : vector<16x128xf32>
    %c0_183 = arith.constant 0 : index
    %c0_184 = arith.constant 0 : index
    %193 = vector.load %arg11[%c0_183, %c0_184] : memref<16x128xf32, #tpu.memory_space<vmem>>, vector<16x128xf32>
    tpu.vector_store %arg11[%c0_183, %c0_184], %192 {strides = array<i32>} : memref<16x128xf32, #tpu.memory_space<vmem>>, vector<16x128xf32>,
    %cst_185 = arith.constant 0.000000e+00 : f32
    %194 = vector.broadcast %cst_185 : f32 to vector<16x128xf32>
    %195 = arith.maximumf %192, %194 : vector<16x128xf32>
    %c0_186 = arith.constant 0 : index
    %c0_187 = arith.constant 0 : index
    %196 = vector.load %arg12[%c0_186, %c0_187] : memref<16x128xf32, #tpu.memory_space<vmem>>, vector<16x128xf32>
    tpu.vector_store %arg12[%c0_186, %c0_187], %195 {strides = array<i32>} : memref<16x128xf32, #tpu.memory_space<vmem>>, vector<16x128xf32>,
    return
  }
}

</mosaic_0001>

<bundles_post_ra>
// kernel: _forward_jit.1
= control target key start
LH: loop header
LB: loop body
LE: loop exit
PB: predicated region body
PF: predicated region fallthrough
CT: control target
= control target key end

     0   :  { %v68_v0 = vlaneseq  ;;  %vm48_vm0 = vcmask 138240   ;;  %v3708_v2 = vmov 0.0   ;;  %s3709_s23 = smov 17   ;;  %s3710_s15 = smov 1   ;;  %vm36_vm1 = vcmask 273408   ;;  %s4503_s0 = inlined_call_operand.vmem [shape: f32[4,512], index: 0, kind: input, shape index: {}]   ;;  %s4504_s3 = inlined_call_operand.vmem [shape: f32[9,1,512], index: 3, kind: input, shape index: {}]   ;;  %s4505_s2 = inlined_call_operand.vmem [shape: f32[8,1], index: 2, kind: input, shape index: {}]   ;;  %s4506_s1 = inlined_call_operand.vmem [shape: f32[9,8,4], index: 1, kind: input, shape index: {}]   ;;  %s4507_s8 = inlined_call_operand.vmem [shape: f32[8,512], index: 8, kind: output, shape index: {0}]   ;;  %s4508_s9 = inlined_call_operand.vmem [shape: f32[8,512], index: 9, kind: output, shape index: {1}]   ;;  %s4509_s7 = inlined_call_operand.vmem [shape: f32[512,128], index: 7, kind: input, shape index: {}]   ;;  %s4510_s6 = inlined_call_operand.vmem [shape: f32[9,1,128], index: 6, kind: input, shape index: {}]   ;;  %s4511_s10 = inlined_call_operand.vmem [shape: f32[8,128], index: 10, kind: output, shape index: {2}]   ;;  %s4512_s4 = inlined_call_operand.vmem [shape: f32[9,16,8], index: 4, kind: input, shape index: {}]   ;;  %s4513_s5 = inlined_call_operand.vmem [shape: f32[16,1], index: 5, kind: input, shape index: {}]   ;;  %s4514_s11 = inlined_call_operand.vmem [shape: f32[16,128], index: 11, kind: output, shape index: {3}]   ;;  %s4515_s12 = inlined_call_operand.vmem [shape: f32[16,128], index: 12, kind: output, shape index: {4}]  }
   0x1   :  { %v38_v1 = vld [vmem:[%s4503_s0] sm:$0xff]  ;;  %34 = vst [vmem:[#allocation2] sm:$0xff] %v3708_v2  ;;  %2019 = vst.msk [vmem:[#allocation3 + $0x20] sm:$0xff] %vm48_vm0, %v3708_v2  ;;  %226 = vmatprep.mubr.f32.mxu1 %v3708_v2  ;;  %1035 = vmatprep.mubr.f32.mxu0 %v3708_v2  ;;  %v39_v4 = vld [vmem:[%s4503_s0 + $0x8] sm:$0xff]  ;;  %s3711_s16 = smov 2   ;;  %s3712_s19 = smov 16  }
   0x2   :  { %2294 = vst [vmem:[#allocation4] sm:$0xff] %v3708_v2  ;;  %42 = vrot.lane.b32.xlu0 %v38_v1, %s3709_s23  ;;  %v69_v3 = vshrl.u32 %v68_v0, 7  ;;  %v3288_v5 = vld [vmem:[%s4504_s3 + $0x4] sm:$0xf]  ;;  %v3302_v6 = vld [vmem:[%s4504_s3 + $0x8] sm:$0xf] }
   0x3   :  { %v3310_v11 = vld [vmem:[%s4504_s3 + $0xc] sm:$0xf]  ;;  %v3318_v20 = vld [vmem:[%s4504_s3 + $0x10] sm:$0xf]  ;;  %v3326_v29 = vld [vmem:[%s4504_s3 + $0x14] sm:$0xf] }
   0x4   :  { %v3816_v7 = vsub.s32 0, %v69_v3  ;;  %v3818_v8 = vsub.s32 1, %v69_v3  ;;  %v3820_v9 = vsub.s32 2, %v69_v3  ;;  %v3822_v10 = vsub.s32 3, %v69_v3  ;;  %37 = vst.msk [vmem:[#allocation2 + $0x10] sm:$0xf] %vm36_vm1, %v3708_v2 }
   0x5   :  { %v3334_v36 = vld [vmem:[%s4504_s3 + $0x18] sm:$0xf]  ;;  %v66_v37 = vld [vmem:[%s4504_s3] sm:$0xf]  ;;  %v3342_v44 = vld [vmem:[%s4504_s3 + $0x1c] sm:$0xf] }
   0x6   :  { %44 = vrot.lane.b32.xlu0 %v39_v4, %s3709_s23  ;;  %v99_v12 = vrot.slane %v3288_v5, %v3816_v7  ;;  %v103_v13 = vrot.slane %v3288_v5, %v3818_v8  ;;  %v472_v14 = vrot.slane %v3302_v6, %v3816_v7  ;;  %v476_v15 = vrot.slane %v3302_v6, %v3818_v8  ;;  %s3713_s27 = smov 18   ;;  %v3350_v57 = vld [vmem:[%s4504_s3 + $0x20] sm:$0xf]  ;;  %s3714_s30 = smov 32  }
   0x7   :  { %v107_v16 = vrot.slane %v3288_v5, %v3820_v9  ;;  %v111_v17 = vrot.slane %v3288_v5, %v3822_v10  ;;  %v691_v18 = vrot.slane %v3310_v11, %v3816_v7  ;;  %v695_v19 = vrot.slane %v3310_v11, %v3818_v8  ;;  %s3715_s13 = smov 33   ;;  %s3716_s3 = smov 34  }
   0x8   :  { %v112_v21 = vcombine.low %v99_v12, %v103_v13  ;;  %v485_v22 = vcombine.low %v472_v14, %v476_v15  ;;  %v480_v24 = vrot.slane %v3302_v6, %v3820_v9  ;;  %v484_v25 = vrot.slane %v3302_v6, %v3822_v10  ;;  %s3717_s0 = smov 127   ;;  %s3718_s14 = smov 126  }
   0x9   :  { %v113_v23 = vcombine.low %v107_v16, %v111_v17  ;;  %v704_v26 = vcombine.low %v691_v18, %v695_v19  ;;  %v910_v27 = vrot.slane %v3318_v20, %v3816_v7  ;;  %v914_v28 = vrot.slane %v3318_v20, %v3818_v8  ;;  %s3719_s17 = smov 112   ;;  %s3720_s18 = smov 111  }
   0xa   :  { %114 = vrot.lane.b32.xlu1 %v112_v21, %s3710_s15  ;;  %487 = vrot.lane.b32.xlu0 %v485_v22, %s3711_s16  ;;  %v486_v30 = vcombine.low %v480_v24, %v484_v25  ;;  %v699_v31 = vrot.slane %v3310_v11, %v3820_v9  ;;  %v703_v32 = vrot.slane %v3310_v11, %v3822_v10  ;;  %vm1149_vm2 = vcmask 146432   ;;  %s3721_s20 = smov 110   ;;  %s3722_s21 = smov 96  }
   0xb   :  { %v923_v33 = vcombine.low %v910_v27, %v914_v28  ;;  %v1128_v34 = vrot.slane %v3326_v29, %v3816_v7  ;;  %v1132_v35 = vrot.slane %v3326_v29, %v3818_v8  ;;  %v918_v39 = vrot.slane %v3318_v20, %v3820_v9  ;;  %2295 = vst.msk [vmem:[#allocation4 + $0x8] sm:$0xff] %vm1149_vm2, %v3708_v2  ;;  %s3723_s22 = smov 95   ;;  %s3724_s24 = smov 94  }
   0xc   :  { %v705_v38 = vcombine.low %v699_v31, %v703_v32  ;;  %v922_v40 = vrot.slane %v3318_v20, %v3822_v10  ;;  %v1347_v41 = vrot.slane %v3334_v36, %v3816_v7  ;;  %v1351_v43 = vrot.slane %v3334_v36, %v3818_v8 }
   0xd   :  { %v1141_v42 = vcombine.low %v1128_v34, %v1132_v35  ;;  %v71_v45 = vrot.slane %v66_v37, %v3816_v7  ;;  %v75_v46 = vrot.slane %v66_v37, %v3818_v8  ;;  %v79_v47 = vrot.slane %v66_v37, %v3820_v9 }
   0xe   :  { %116 = vrot.lane.b32.xlu1 %v113_v23, %s3710_s15  ;;  %706 = vrot.lane.b32.xlu0 %v704_v26, %s3712_s19  ;;  %v1136_v48 = vrot.slane %v3326_v29, %v3820_v9  ;;  %v83_v49 = vrot.slane %v66_v37, %v3822_v10  ;;  %v924_v50 = vcombine.low %v918_v39, %v922_v40  ;;  %vm56_vm3 = vcmask 1043592  }
   0xf   :  { %v1140_v51 = vrot.slane %v3326_v29, %v3822_v10  ;;  %v1566_v52 = vrot.slane %v3342_v44, %v3816_v7  ;;  %v84_v53 = vcombine.low %v71_v45, %v75_v46  ;;  %v1360_v54 = vcombine.low %v1347_v41, %v1351_v43 }
  0x10   :  { %v1570_v55 = vrot.slane %v3342_v44, %v3818_v8  ;;  %v85_v56 = vcombine.low %v79_v47, %v83_v49  ;;  %v1355_v59 = vrot.slane %v3334_v36, %v3820_v9  ;;  %v1359_v60 = vrot.slane %v3334_v36, %v3822_v10 }
  0x11   :  { %v1142_v58 = vcombine.low %v1136_v48, %v1140_v51  ;;  %v1793_v62 = vrot.slane %v3350_v57, %v3820_v9  ;;  %v1797_v63 = vrot.slane %v3350_v57, %v3822_v10  ;;  %v1574_v0 = vrot.slane %v3342_v44, %v3820_v9 }
  0x12   :  { %489 = vrot.lane.b32.xlu1 %v486_v30, %s3711_s16  ;;  %925 = vrot.lane.b32.xlu0 %v923_v33, %s3709_s23  ;;  %v1579_v61 = vcombine.low %v1566_v52, %v1570_v55  ;;  %v1361_v1 = vcombine.low %v1355_v59, %v1359_v60  ;;  %v1578_v4 = vrot.slane %v3342_v44, %v3822_v10  ;;  %vm57_vm4 = vcmask 1047556  }
  0x13   :  { %v1799_v3 = vcombine.low %v1793_v62, %v1797_v63  ;;  %v1785_v6 = vrot.slane %v3350_v57, %v3816_v7  ;;  %v1789_v11 = vrot.slane %v3350_v57, %v3818_v8  ;;  %vm58_vm5 = vmor %vm57_vm4, %vm56_vm3  ;;  %vm50_vm6 = vcmask 1043456  }
  0x14   :  { %v1580_v5 = vcombine.low %v1574_v0, %v1578_v4  ;;  %vm61_vm7 = vcmask 134144   ;;  %vm120_vm8 = vcmask 7168   ;;  %vm493_vm9 = vcmask 15360  }
  0x15   :  { %v1798_v12 = vcombine.low %v1785_v6, %v1789_v11  ;;  %vm712_vm10 = vcmask 130048   ;;  %vm1368_vm11 = vcmask 261120   ;;  %vm1587_vm12 = vcmask 269312  }
  0x16   :  { %708 = vrot.lane.b32.xlu1 %v705_v38, %s3712_s19  ;;  %1143 = vrot.lane.b32.xlu0 %v1141_v42, %s3713_s27  ;;  %vm1806_vm13 = vcmask 277504   ;;  %vm145_vm14 = vcmask 1039360   ;;  %vm150_vm15 = vcmask 31744   ;;  %vm737_vm1 = vcmask 916480  }
  0x17   :  { %vm1174_vm3 = vcmask 900096   ;;  %vm1393_vm4 = vcmask 785408  }
  0x1a   :  { %927 = vrot.lane.b32.xlu1 %v924_v50, %s3709_s23  ;;  %1362 = vrot.lane.b32.xlu0 %v1360_v54, %s3714_s30 }
  0x1e   :  { %1145 = vrot.lane.b32.xlu1 %v1142_v58, %s3713_s27  ;;  %1581 = vrot.lane.b32.xlu0 %v1579_v61, %s3715_s13 }
  0x22   :  { %1364 = vrot.lane.b32.xlu1 %v1361_v1, %s3714_s30  ;;  %1802 = vrot.lane.b32.xlu0 %v1799_v3, %s3716_s3  ;;  %s3726_s30 = smov 8  }
  0x26   :  { %1583 = vrot.lane.b32.xlu1 %v1580_v5, %s3715_s13 }
  0x2a   :  { %1800 = vrot.lane.b32.xlu1 %v1798_v12, %s3716_s3  ;;  %s3727_s3 = smov 10  }
  0x74   :  { %v43_v9 = vpop.permute.xlu0 %42 }
  0x75   :  { %v46_v13 = vrot.slane %v43_v9, 4 }
  0x77   :  { %v49_v14 = vsel %vm48_vm0, %v46_v13, %v43_v9 }
  0x78   :  { %59 = vst.msk [vmem:[#allocation2] sm:$0xff] %vm58_vm5, %v49_v14  ;;  %v45_v10 = vpop.permute.xlu0 %44  ;;  %vm1612_vm5 = vcmask 777216  }
  0x79   :  { %v47_v15 = vrot.slane %v45_v10, 4 }
  0x7b   :  { %v51_v16 = vsel %vm50_vm6, %v46_v13, %v47_v15  ;;  %62 = vst.msk [vmem:[#allocation2 + $0x10] sm:$0xf] %vm61_vm7, %v47_v15  ;;  %vm1831_vm7 = vcmask 769024  }
  0x7c   :  { %v3898_v7 = vsel %vm48_vm0, %v51_v16, %v45_v10  ;;  %v115_v8 = vpop.permute.xlu1 %114  ;;  %v488_v19 = vpop.permute.xlu0 %487 }
  0x7d   :  { %v3901_v17 = vmul.f32 %v85_v56, %v3898_v7  ;;  %v118_v21 = vrot.slane %v115_v8, 4  ;;  %v491_v24 = vrot.slane %v488_v19, 4 }
  0x7f   :  { %v3903_v18 = vld [vmem:[#allocation2] sm:$0xff]  ;;  %v121_v28 = vsel %vm120_vm8, %v118_v21, %v115_v8  ;;  %v494_v34 = vsel %vm493_vm9, %v491_v24, %v488_v19 }
  0x80   :  { %v3906_v20 = vmul.f32 %v84_v53, %v3903_v18  ;;  %v117_v22 = vpop.permute.xlu1 %116  ;;  %v707_v32 = vpop.permute.xlu0 %706  ;;  %v127_v35 = vmul.f32 %v121_v28, %v3903_v18  ;;  %v500_v37 = vmul.f32 %v494_v34, %v3903_v18 }
  0x81   :  { %v119_v23 = vrot.slane %v117_v22, 4  ;;  %v710_v36 = vrot.slane %v707_v32, 4 }
  0x82   :  { %v90_v25 = vld [vmem:[#allocation2 + $0x10] sm:$0xf]  ;;  %v133_v39 = vcombine.high %v127_v35, %v127_v35  ;;  %v506_v43 = vcombine.high %v500_v37, %v500_v37 }
  0x83   :  { %v122_v26 = vsel %vm50_vm6, %v118_v21, %v119_v23  ;;  %v129_v27 = vmul.f32 %v119_v23, %v90_v25  ;;  %v713_v40 = vsel %vm712_vm10, %v710_v36, %v707_v32  ;;  %v463_v52 = vld [vmem:[#allocation2 + $0x10] sm:$0xf] }
  0x84   :  { %v123_v29 = vsel %vm120_vm8, %v122_v26, %v117_v22  ;;  %v490_v30 = vpop.permute.xlu1 %489  ;;  %v719_v44 = vmul.f32 %v713_v40, %v3903_v18  ;;  %v926_v46 = vpop.permute.xlu0 %925  ;;  %v682_v61 = vld [vmem:[#allocation2 + $0x10] sm:$0xf]  ;;  %vm2302_vm8 = vcmask 72704  }
  0x85   :  { %v128_v31 = vmul.f32 %v123_v29, %v3898_v7  ;;  %v492_v33 = vrot.slane %v490_v30, 4  ;;  %143 = vrot.lane.b32.xlu0 %v129_v27, %s3717_s0  ;;  %v929_v49 = vrot.slane %v926_v46, 4  ;;  %v901_v14 = vld [vmem:[#allocation2 + $0x10] sm:$0xf] }
  0x86   :  { %v725_v51 = vcombine.high %v719_v44, %v719_v44 }
  0x87   :  { %139 = vrot.lane.b32.xlu1 %v128_v31, %s3717_s0  ;;  %v495_v38 = vsel %vm50_vm6, %v491_v24, %v492_v33  ;;  %v134_v48 = vcombine.high %v128_v31, %v128_v31  ;;  %v502_v53 = vmul.f32 %v492_v33, %v463_v52  ;;  %v931_v54 = vsel %vm48_vm0, %v929_v49, %v926_v46  ;;  %v1119_v33 = vld [vmem:[#allocation2 + $0x10] sm:$0xf] }
  0x88   :  { %v496_v41 = vsel %vm493_vm9, %v495_v38, %v490_v30  ;;  %v709_v42 = vpop.permute.xlu1 %708  ;;  %v937_v57 = vmul.f32 %v931_v54, %v3903_v18  ;;  %v1144_v59 = vpop.permute.xlu0 %1143  ;;  %vm2339_vm9 = vcmask 64512  }
  0x89   :  { %135 = vrot.lane.b32.xlu0 %v127_v35, %s3717_s0  ;;  %v501_v45 = vmul.f32 %v496_v41, %v3898_v7  ;;  %v711_v47 = vrot.slane %v709_v42, 4  ;;  %v1147_v63 = vrot.slane %v1144_v59, 4 }
  0x8a   :  { %v943_v1 = vcombine.high %v937_v57, %v937_v57 }
  0x8b   :  { %508 = vrot.lane.b32.xlu1 %v500_v37, %s3718_s14  ;;  %v714_v50 = vsel %vm50_vm6, %v710_v36, %v711_v47  ;;  %v721_v62 = vmul.f32 %v711_v47, %v682_v61  ;;  %v507_v3 = vcombine.high %v501_v45, %v501_v45  ;;  %v1150_v4 = vsel %vm1149_vm2, %v1147_v63, %v1144_v59 }
  0x8c   :  { %v715_v55 = vsel %vm712_vm10, %v714_v50, %v709_v42  ;;  %v928_v56 = vpop.permute.xlu1 %927  ;;  %v1156_v11 = vmul.f32 %v1150_v4, %v3903_v18  ;;  %v1363_v9 = vpop.permute.xlu0 %1362  ;;  %vm2629_vm10 = vcmask 982016  }
  0x8d   :  { %137 = vrot.lane.b32.xlu0 %v133_v39, %s3717_s0  ;;  %v720_v58 = vmul.f32 %v715_v55, %v3898_v7  ;;  %v930_v60 = vrot.slane %v928_v56, 4  ;;  %v1366_v15 = vrot.slane %v1363_v9, 4 }
  0x8e   :  { %v1162_v8 = vcombine.high %v1156_v11, %v1156_v11 }
  0x8f   :  { %510 = vrot.lane.b32.xlu1 %v506_v43, %s3718_s14  ;;  %v932_v0 = vsel %vm50_vm6, %v929_v49, %v930_v60  ;;  %v939_v10 = vmul.f32 %v930_v60, %v901_v14  ;;  %v726_v19 = vcombine.high %v720_v58, %v720_v58  ;;  %v1369_v21 = vsel %vm1368_vm11, %v1366_v15, %v1363_v9 }
  0x90   :  { %v933_v5 = vsel %vm48_vm0, %v932_v0, %v928_v56  ;;  %v1146_v6 = vpop.permute.xlu1 %1145  ;;  %v1375_v24 = vmul.f32 %v1369_v21, %v3903_v18  ;;  %v1582_v26 = vpop.permute.xlu0 %1581  ;;  %v1557_v56 = vld [vmem:[#allocation2 + $0x10] sm:$0xf]  ;;  %v3725_v60 = vmov 0   ;;  %v1993_v0 = vld [vmem:[%s4505_s2] sm:$0xff]  ;;  %vm518_vm0 = vcmask 1031168   ;;  %s3729_s2 = smov 120  }
  0x91   :  { %512 = vrot.lane.b32.xlu0 %v501_v45, %s3718_s14  ;;  %v938_v12 = vmul.f32 %v933_v5, %v3898_v7  ;;  %v1148_v13 = vrot.slane %v1146_v6, 4  ;;  %v1585_v29 = vrot.slane %v1582_v26, 4  ;;  %v1338_v45 = vld [vmem:[#allocation2 + $0x10] sm:$0xf]  ;;  %3707 = vset.pattern.permute.xlu1 %v3725_v60 }
  0x92   :  { %v1381_v32 = vcombine.high %v1375_v24, %v1375_v24  ;;  %3686 = vset.pattern.permute.xlu0 %v3725_v60 }
  0x93   :  { %141 = vrot.lane.b32.xlu1 %v134_v48, %s3717_s0  ;;  %v1151_v16 = vsel %vm50_vm6, %v1147_v63, %v1148_v13  ;;  %v944_v28 = vcombine.high %v938_v12, %v938_v12  ;;  %v1158_v34 = vmul.f32 %v1148_v13, %v1119_v33  ;;  %v1588_v35 = vsel %vm1587_vm12, %v1585_v29, %v1582_v26 }
  0x94   :  { %v1152_v22 = vsel %vm1149_vm2, %v1151_v16, %v1146_v6  ;;  %v1365_v23 = vpop.permute.xlu1 %1364  ;;  %v1594_v37 = vmul.f32 %v1588_v35, %v3903_v18  ;;  %v1803_v50 = vpop.permute.xlu0 %1802  ;;  %v306_v16 = vcombine.high %v3906_v20, %v3906_v20  ;;  %vm955_vm2 = vcmask 908288   ;;  %v3317_v35 = vld [vmem:[%s4506_s1 + $0x20] sm:$0xff] }
  0x95   :  { %729 = vrot.lane.b32.xlu0 %v725_v51, %s3719_s17  ;;  %v1157_v25 = vmul.f32 %v1152_v22, %v3898_v7  ;;  %v1367_v27 = vrot.slane %v1365_v23, 4  ;;  %v65_v22 = vld [vmem:[%s4506_s1] sm:$0xff] }
  0x97   :  { %516 = vrot.lane.b32.xlu1 %v502_v53, %s3718_s14  ;;  %v1370_v30 = vsel %vm50_vm6, %v1366_v15, %v1367_v27  ;;  %v1163_v41 = vcombine.high %v1157_v25, %v1157_v25  ;;  %v1377_v46 = vmul.f32 %v1367_v27, %v1338_v45  ;;  %v1805_v53 = vrot.slane %v1803_v50, 4 }
  0x98   :  { %v1584_v31 = vpop.permute.xlu1 %1583  ;;  %v1371_v36 = vsel %vm1368_vm11, %v1370_v30, %v1365_v23  ;;  %vm2736_vm11 = vcmask 973824  }
  0x99   :  { %727 = vrot.lane.b32.xlu0 %v719_v44, %s3719_s17  ;;  %v1376_v38 = vmul.f32 %v1371_v36, %v3898_v7  ;;  %v1586_v39 = vrot.slane %v1584_v31, 4  ;;  %v1600_v44 = vcombine.high %v1594_v37, %v1594_v37 }
  0x9b   :  { %731 = vrot.lane.b32.xlu1 %v720_v58, %s3719_s17  ;;  %v1589_v43 = vsel %vm50_vm6, %v1585_v29, %v1586_v39  ;;  %v1382_v49 = vcombine.high %v1376_v38, %v1376_v38 }
  0x9c   :  { %v1801_v40 = vpop.permute.xlu1 %1800  ;;  %v1590_v47 = vsel %vm1587_vm12, %v1589_v43, %v1584_v31  ;;  %vm2843_vm12 = vcmask 965632  }
  0x9d   :  { %735 = vrot.lane.b32.xlu0 %v721_v62, %s3719_s17  ;;  %v1804_v42 = vrot.slane %v1801_v40, 4  ;;  %v1595_v51 = vmul.f32 %v1590_v47, %v3898_v7  ;;  %v1776_v62 = vld [vmem:[#allocation2 + $0x10] sm:$0xf]  ;;  %v3325_v47 = vld [vmem:[%s4506_s1 + $0x28] sm:$0xff] }
  0x9e   :  { %v1815_v63 = vmul.f32 %v1805_v53, %v1776_v62 }
  0x9f   :  { %947 = vrot.lane.b32.xlu1 %v943_v1, %s3720_s18  ;;  %v1807_v48 = vsel %vm1806_vm13, %v1804_v42, %v1801_v40  ;;  %v1808_v54 = vsel %vm50_vm6, %v1804_v42, %v1805_v53  ;;  %v1601_v59 = vcombine.high %v1595_v51, %v1595_v51 }
  0xa0   :  { %v1813_v52 = vmul.f32 %v1807_v48, %v3903_v18  ;;  %v1809_v58 = vsel %vm1806_vm13, %v1808_v54, %v1803_v50 }
  0xa1   :  { %514 = vrot.lane.b32.xlu0 %v507_v3, %s3718_s14  ;;  %v1814_v18 = vmul.f32 %v1809_v58, %v3898_v7 }
  0xa2   :  { %v1819_v55 = vcombine.high %v1813_v52, %v1813_v52 }
  0xa3   :  { %945 = vrot.lane.b32.xlu1 %v937_v57, %s3720_s18  ;;  %v1596_v57 = vmul.f32 %v1586_v39, %v1557_v56  ;;  %v1820_v61 = vcombine.high %v1814_v18, %v1814_v18  ;;  %v3309_v39 = vld [vmem:[%s4506_s1 + $0x18] sm:$0xff] }
  0xa5   :  { %949 = vrot.lane.b32.xlu0 %v938_v12, %s3720_s18  ;;  %v3287_v12 = vld [vmem:[%s4506_s1 + $0x8] sm:$0xff] }
  0xa7   :  { %953 = vrot.lane.b32.xlu1 %v939_v10, %s3720_s18 }
  0xa9   :  { %1166 = vrot.lane.b32.xlu0 %v1162_v8, %s3721_s20 }
  0xab   :  { %733 = vrot.lane.b32.xlu1 %v726_v19, %s3719_s17  ;;  %v307_v19 = vcombine.high %v3901_v17, %v3901_v17 }
  0xad   :  { %1164 = vrot.lane.b32.xlu0 %v1156_v11, %s3721_s20 }
  0xaf   :  { %1168 = vrot.lane.b32.xlu1 %v1157_v25, %s3721_s20 }
  0xb1   :  { %951 = vrot.lane.b32.xlu0 %v944_v28, %s3720_s18  ;;  %v3301_v28 = vld [vmem:[%s4506_s1 + $0x10] sm:$0xff] }
  0xb3   :  { %1385 = vrot.lane.b32.xlu1 %v1381_v32, %s3722_s21 }
  0xb5   :  { %1172 = vrot.lane.b32.xlu0 %v1158_v34, %s3721_s20 }
  0xb7   :  { %1383 = vrot.lane.b32.xlu1 %v1375_v24, %s3722_s21 }
  0xb9   :  { %1387 = vrot.lane.b32.xlu0 %v1376_v38, %s3722_s21 }
  0xbb   :  { %1170 = vrot.lane.b32.xlu1 %v1163_v41, %s3721_s20 }
  0xbd   :  { %1604 = vrot.lane.b32.xlu0 %v1600_v44, %s3723_s22 }
  0xbf   :  { %1391 = vrot.lane.b32.xlu1 %v1377_v46, %s3722_s21 }
  0xc1   :  { %1389 = vrot.lane.b32.xlu0 %v1382_v49, %s3722_s21 }
  0xc3   :  { %1606 = vrot.lane.b32.xlu1 %v1595_v51, %s3723_s22 }
  0xc5   :  { %1602 = vrot.lane.b32.xlu0 %v1594_v37, %s3723_s22 }
  0xc7   :  { %1823 = vrot.lane.b32.xlu1 %v1819_v55, %s3724_s24 }
  0xc9   :  { %1610 = vrot.lane.b32.xlu0 %v1596_v57, %s3723_s22  ;;  %v3333_v57 = vld [vmem:[%s4506_s1 + $0x30] sm:$0xff] }
  0xcb   :  { %1608 = vrot.lane.b32.xlu1 %v1601_v59, %s3723_s22 }
  0xcd   :  { %1825 = vrot.lane.b32.xlu0 %v1814_v18, %s3724_s24 }
  0xcf   :  { %1821 = vrot.lane.b32.xlu1 %v1813_v52, %s3724_s24 }
  0xd1   :  { %1827 = vrot.lane.b32.xlu0 %v1820_v61, %s3724_s24 }
  0xd3   :  { %1829 = vrot.lane.b32.xlu1 %v1815_v63, %s3724_s24  ;;  %s3728_s24 = smov 9  }
  0xd5   :  { %1996 = vperm.xlu0 %3686, %v1993_v0  }
  0xf7   :  { %v144_v1 = vpop.permute.xlu0 %143 }
  0xf9   :  { %v140_v3 = vpop.permute.xlu1 %139 }
  0xfb   :  { %v136_v4 = vpop.permute.xlu0 %135 }
  0xfd   :  { %v509_v5 = vpop.permute.xlu1 %508 }
  0xff   :  { %v138_v6 = vpop.permute.xlu0 %137 }
 0x100   :  { %v147_v7 = vsel %vm145_vm14, %v138_v6, %v140_v3  ;;  %v146_v11 = vsel %vm145_vm14, %v136_v4, %v138_v6  ;;  %v3341_v6 = vld [vmem:[%s4506_s1 + $0x38] sm:$0xff] }
 0x101   :  { %v511_v9 = vpop.permute.xlu1 %510  ;;  %3289 = vmatprep.subr.msk.mxu1 %vm50_vm6, %v147_v7 }
 0x102   :  { %3290 = vmatpush1.msk.msra.mxu1 %vm50_vm6, %v146_v11  ;;  %v519_v26 = vsel %vm518_vm0, %v509_v5, %v511_v9 }
 0x103   :  { %v513_v13 = vpop.permute.xlu0 %512  ;;  %3291 = vmatmul.mubr.msk.f32.vlgmr.msra.gmra.mrb[0].mxu1 %vm150_vm15, %v3287_v12 }
 0x104   :  { %297 = vmatprep.mubr.f32.mxu1 %v3708_v2  ;;  %v520_v25 = vsel %vm518_vm0, %v511_v9, %v513_v13 }
 0x105   :  { %v142_v14 = vpop.permute.xlu1 %141 }
 0x106   :  { %v148_v10 = vsel %vm145_vm14, %v140_v3, %v142_v14  ;;  %v149_v15 = vsel %vm145_vm14, %v142_v14, %v144_v1 }
 0x107   :  { %3292 = vmatprep.subr.msk.mxu1 %vm50_vm6, %v149_v15  ;;  %v730_v8 = vpop.permute.xlu0 %729 }
 0x108   :  { %3293 = vmatpush1.msk.msra.mxu1 %vm50_vm6, %v148_v10 }
 0x109   :  { %v517_v21 = vpop.permute.xlu1 %516  ;;  %3294 = vmatmul.mubr.msk.f32.vlgmr.msra.gmra.mrb[2].mxu1 %vm150_vm15, %v3287_v12  ;;  %3295 = vmatprep.subr.msk.mxu1 %vm50_vm6, %v306_v16 }
 0x10a   :  { %3296 = vmatpush1.msk.msra.mxu1 %vm50_vm6, %v3906_v20  ;;  %383 = vmatprep.mubr.f32.mxu1 %v3708_v2 }
 0x10b   :  { %3298 = vmatprep.subr.msk.mxu1 %vm50_vm6, %v307_v19  ;;  %v728_v23 = vpop.permute.xlu0 %727 }
 0x10c   :  { %v738_v36 = vsel %vm737_vm1, %v728_v23, %v730_v8 }
 0x10d   :  { %v732_v24 = vpop.permute.xlu1 %731  ;;  %3297 = vmatmul.mubr.msk.f32.vlgmr.msra.gmra.mrb[0].mxu1 %vm150_vm15, %v65_v22 }
 0x10e   :  { %3299 = vmatpush1.msk.msra.mxu1 %vm50_vm6, %v3901_v17  ;;  %454 = vmatprep.mubr.f32.mxu1 %v3708_v2  ;;  %v739_v32 = vsel %vm737_vm1, %v730_v8, %v732_v24  ;;  %v3349_v8 = vld [vmem:[%s4506_s1 + $0x40] sm:$0xff] }
 0x10f   :  { %3303 = vmatprep.subr.msk.mxu1 %vm50_vm6, %v520_v25  ;;  %v736_v20 = vpop.permute.xlu0 %735 }
 0x111   :  { %v948_v27 = vpop.permute.xlu1 %947  ;;  %3300 = vmatmul.mubr.msk.f32.vlgmr.msra.gmra.mrb[2].mxu1 %vm150_vm15, %v65_v22 }
 0x112   :  { %3304 = vmatpush1.msk.msra.mxu1 %vm50_vm6, %v519_v26  ;;  %598 = vmatprep.mubr.f32.mxu1 %v3708_v2 }
 0x113   :  { %v515_v29 = vpop.permute.xlu0 %514 }
 0x114   :  { %v521_v17 = vsel %vm518_vm0, %v513_v13, %v515_v29  ;;  %v522_v30 = vsel %vm518_vm0, %v515_v29, %v517_v21 }
 0x115   :  { %v946_v31 = vpop.permute.xlu1 %945  ;;  %3305 = vmatmul.mubr.msk.f32.vlgmr.msra.gmra.mrb[0].mxu1 %vm150_vm15, %v3301_v28  ;;  %3306 = vmatprep.subr.msk.mxu1 %vm50_vm6, %v522_v30 }
 0x116   :  { %3307 = vmatpush1.msk.msra.mxu1 %vm50_vm6, %v521_v17  ;;  %669 = vmatprep.mubr.f32.mxu1 %v3708_v2  ;;  %v956_v38 = vsel %vm955_vm2, %v946_v31, %v948_v27 }
 0x117   :  { %3311 = vmatprep.subr.msk.mxu1 %vm50_vm6, %v739_v32  ;;  %v950_v33 = vpop.permute.xlu0 %949 }
 0x118   :  { %v957_v34 = vsel %vm955_vm2, %v948_v27, %v950_v33 }
 0x119   :  { %v954_v37 = vpop.permute.xlu1 %953  ;;  %3308 = vmatmul.mubr.msk.f32.vlgmr.msra.gmra.mrb[2].mxu1 %vm150_vm15, %v3301_v28  ;;  %3319 = vmatprep.subr.msk.mxu0 %vm50_vm6, %v957_v34 }
 0x11a   :  { %3312 = vmatpush1.msk.msra.mxu1 %vm50_vm6, %v738_v36  ;;  %3320 = vmatpush1.msk.msra.mxu0 %vm50_vm6, %v956_v38 }
 0x11b   :  { %v1167_v40 = vpop.permute.xlu0 %1166  ;;  %817 = vmatprep.mubr.f32.mxu1 %v3708_v2  ;;  %3321 = vmatmul.mubr.msk.f32.vlgmr.msra.gmra.mrb[0].mxu0 %vm150_vm15, %v3317_v35 }
 0x11c   :  { %1254 = vmatprep.mubr.f32.mxu0 %v3708_v2 }
 0x11d   :  { %v734_v41 = vpop.permute.xlu1 %733  ;;  %3313 = vmatmul.mubr.msk.f32.vlgmr.msra.gmra.mrb[0].mxu1 %vm150_vm15, %v3309_v39 }
 0x11e   :  { %v740_v42 = vsel %vm737_vm1, %v732_v24, %v734_v41  ;;  %v741_v43 = vsel %vm737_vm1, %v734_v41, %v736_v20  ;;  %888 = vmatprep.mubr.f32.mxu1 %v3708_v2 }
 0x11f   :  { %3314 = vmatprep.subr.msk.mxu1 %vm50_vm6, %v741_v43  ;;  %v1165_v44 = vpop.permute.xlu0 %1164  ;;  %v2138_v43 = vld [vmem:[%s4509_s7 + $0x188] sm:$0xff] }
 0x120   :  { %3315 = vmatpush1.msk.msra.mxu1 %vm50_vm6, %v740_v42  ;;  %v1175_v48 = vsel %vm1174_vm3, %v1165_v44, %v1167_v40  ;;  %v2137_v42 = vld [vmem:[%s4509_s7 + $0x180] sm:$0xff] }
 0x121   :  { %v1169_v45 = vpop.permute.xlu1 %1168  ;;  %3316 = vmatmul.mubr.msk.f32.vlgmr.msra.gmra.mrb[2].mxu1 %vm150_vm15, %v3309_v39  ;;  %v2105_v44 = vld [vmem:[%s4509_s7 + $0x80] sm:$0xff] }
 0x122   :  { %v1176_v46 = vsel %vm1174_vm3, %v1167_v40, %v1169_v45  ;;  %1106 = vmatprep.mubr.f32.mxu1 %v3708_v2  ;;  %v4149_v40 = vld [vmem:[#allocation3 + $0x20] sm:$0xff] }
 0x123   :  { %3327 = vmatprep.subr.msk.mxu0 %vm50_vm6, %v1176_v46  ;;  %v952_v49 = vpop.permute.xlu0 %951  ;;  %v2106_v46 = vld [vmem:[%s4509_s7 + $0x88] sm:$0xff] }
 0x124   :  { %v958_v50 = vsel %vm955_vm2, %v950_v33, %v952_v49  ;;  %v959_v51 = vsel %vm955_vm2, %v952_v49, %v954_v37  ;;  %3328 = vmatpush1.msk.msra.mxu0 %vm50_vm6, %v1175_v48  ;;  %v2122_v48 = vld [vmem:[%s4509_s7 + $0x108] sm:$0xff]  ;;  %v3550_v49 = vpack.c.bf16 %v2106_v46, %v2105_v44  ;;  %v2116_v44 = vld [vmem:[%s4509_s7 + $0xd8] sm:$0xff] }
 0x125   :  { %v1386_v52 = vpop.permute.xlu1 %1385  ;;  %3322 = vmatprep.subr.msk.mxu1 %vm50_vm6, %v959_v51  ;;  %3329 = vmatmul.mubr.msk.f32.vlgmr.msra.gmra.mrb[0].mxu0 %vm150_vm15, %v3325_v47  ;;  %v2089_v51 = vld [vmem:[%s4509_s7] sm:$0xff] }
 0x126   :  { %3323 = vmatpush1.msk.msra.mxu1 %vm50_vm6, %v958_v50  ;;  %1473 = vmatprep.mubr.f32.mxu0 %v3708_v2 }
 0x127   :  { %v1173_v53 = vpop.permute.xlu0 %1172 }
 0x129   :  { %v1384_v54 = vpop.permute.xlu1 %1383  ;;  %3324 = vmatmul.mubr.msk.f32.vlgmr.msra.gmra.mrb[2].mxu1 %vm150_vm15, %v3317_v35 }
 0x12a   :  { %1325 = vmatprep.mubr.f32.mxu1 %v3708_v2  ;;  %v1394_v58 = vsel %vm1393_vm4, %v1384_v54, %v1386_v52 }
 0x12b   :  { %v1388_v55 = vpop.permute.xlu0 %1387 }
 0x12c   :  { %v1395_v56 = vsel %vm1393_vm4, %v1386_v52, %v1388_v55  ;;  %v2090_v52 = vld [vmem:[%s4509_s7 + $0x8] sm:$0xff] }
 0x12d   :  { %v1171_v59 = vpop.permute.xlu1 %1170  ;;  %3335 = vmatprep.subr.msk.mxu0 %vm50_vm6, %v1395_v56  ;;  %v3552_v54 = vpack.c.bf16 %v2090_v52, %v2089_v51  ;;  %v2107_v56 = vld [vmem:[%s4509_s7 + $0x90] sm:$0xff]  ;;  %v2100_v52 = vld [vmem:[%s4509_s7 + $0x58] sm:$0xff] }
 0x12e   :  { %v1177_v60 = vsel %vm1174_vm3, %v1169_v45, %v1171_v59  ;;  %v1178_v18 = vsel %vm1174_vm3, %v1171_v59, %v1173_v53  ;;  %3336 = vmatpush1.msk.msra.mxu0 %vm50_vm6, %v1394_v58  ;;  %v3582_v45 = vpack.c.bf16 %v2138_v43, %v2137_v42  ;;  %v2139_v53 = vld [vmem:[%s4509_s7 + $0x190] sm:$0xff]  ;;  %v2148_v42 = vld [vmem:[%s4509_s7 + $0x1d8] sm:$0xff] }
 0x12f   :  { %3330 = vmatprep.subr.msk.mxu1 %vm50_vm6, %v1178_v18  ;;  %v1605_v61 = vpop.permute.xlu0 %1604  ;;  %3337 = vmatmul.mubr.msk.f32.vlgmr.msra.gmra.mrb[0].mxu0 %vm150_vm15, %v3333_v57  ;;  %v2124_v18 = vld [vmem:[%s4509_s7 + $0x118] sm:$0xff]  ;;  %v2115_v43 = vld [vmem:[%s4509_s7 + $0xd0] sm:$0xff] }
 0x130   :  { %3331 = vmatpush1.msk.msra.mxu1 %vm50_vm6, %v1177_v60  ;;  %1692 = vmatprep.mubr.f32.mxu0 %v3708_v2  ;;  %v2123_v60 = vld [vmem:[%s4509_s7 + $0x110] sm:$0xff]  ;;  %v3570_v51 = vpack.c.bf16 %v2116_v44, %v2115_v43 }
 0x131   :  { %v1392_v62 = vpop.permute.xlu1 %1391  ;;  %3332 = vmatmul.mubr.msk.f32.vlgmr.msra.gmra.mrb[2].mxu1 %vm150_vm15, %v3325_v47  ;;  %v2121_v47 = vld [vmem:[%s4509_s7 + $0x100] sm:$0xff] }
 0x132   :  { %1544 = vmatprep.mubr.f32.mxu1 %v3708_v2  ;;  %v3584_v50 = vpack.c.bf16 %v2122_v48, %v2121_v47  ;;  %v2131_v48 = vld [vmem:[%s4509_s7 + $0x150] sm:$0xff] }
 0x133   :  { %v1390_v63 = vpop.permute.xlu0 %1389 }
 0x134   :  { %v1396_v0 = vsel %vm1393_vm4, %v1388_v55, %v1390_v63  ;;  %v1397_v1 = vsel %vm1393_vm4, %v1390_v63, %v1392_v62  ;;  %v2140_v55 = vld [vmem:[%s4509_s7 + $0x198] sm:$0xff]  ;;  %v3588_v62 = vpack.c.bf16 %v2124_v18, %v2123_v60  ;;  %v2133_v60 = vld [vmem:[%s4509_s7 + $0x160] sm:$0xff]  ;;  %v2134_v18 = vld [vmem:[%s4509_s7 + $0x168] sm:$0xff] }
 0x135   :  { %v1607_v3 = vpop.permute.xlu1 %1606  ;;  %3338 = vmatprep.subr.msk.mxu1 %vm50_vm6, %v1397_v1  ;;  %v3586_v58 = vpack.c.bf16 %v2140_v55, %v2139_v53  ;;  %v2092_v63 = vld [vmem:[%s4509_s7 + $0x18] sm:$0xff]  ;;  %v2142_v1 = vld [vmem:[%s4509_s7 + $0x1a8] sm:$0xff]  ;;  %v2149_v53 = vld [vmem:[%s4509_s7 + $0x1e0] sm:$0xff] }
 0x136   :  { %v1614_v4 = vsel %vm1612_vm5, %v1605_v61, %v1607_v3  ;;  %3339 = vmatpush1.msk.msra.mxu1 %vm50_vm6, %v1396_v0  ;;  %v2141_v0 = vld [vmem:[%s4509_s7 + $0x1a0] sm:$0xff] }
 0x137   :  { %3343 = vmatprep.subr.msk.mxu0 %vm50_vm6, %v1614_v4  ;;  %v1603_v5 = vpop.permute.xlu0 %1602  ;;  %v3590_v4 = vpack.c.bf16 %v2142_v1, %v2141_v0  ;;  %v2117_v55 = vld [vmem:[%s4509_s7 + $0xe0] sm:$0xff]  ;;  %v2102_v0 = vld [vmem:[%s4509_s7 + $0x68] sm:$0xff] }
 0x138   :  { %v1613_v7 = vsel %vm1612_vm5, %v1603_v5, %v1605_v61  ;;  %v2091_v61 = vld [vmem:[%s4509_s7 + $0x10] sm:$0xff]  ;;  %v2109_v5 = vld [vmem:[%s4509_s7 + $0xa0] sm:$0xff] }
 0x139   :  { %v1824_v11 = vpop.permute.xlu1 %1823  ;;  %3340 = vmatmul.mubr.msk.f32.vlgmr.msra.gmra.mrb[2].mxu1 %vm150_vm15, %v3333_v57  ;;  %3344 = vmatpush1.msk.msra.mxu0 %vm50_vm6, %v1613_v7  ;;  %v2108_v57 = vld [vmem:[%s4509_s7 + $0x98] sm:$0xff]  ;;  %v2125_v7 = vld [vmem:[%s4509_s7 + $0x120] sm:$0xff] }
 0x13a   :  { %3345 = vmatmul.mubr.msk.f32.vlgmr.msra.gmra.mrb[0].mxu0 %vm150_vm15, %v3341_v6  ;;  %1763 = vmatprep.mubr.f32.mxu1 %v3708_v2  ;;  %v3554_v59 = vpack.c.bf16 %v2108_v57, %v2107_v56  ;;  %v2118_v56 = vld [vmem:[%s4509_s7 + $0xe8] sm:$0xff] }
 0x13b   :  { %v1611_v12 = vpop.permute.xlu0 %1610  ;;  %1911 = vmatprep.mubr.f32.mxu0 %v3708_v2 }
 0x13d   :  { %v1609_v9 = vpop.permute.xlu1 %1608 }
 0x13e   :  { %v1615_v13 = vsel %vm1612_vm5, %v1607_v3, %v1609_v9  ;;  %v1616_v14 = vsel %vm1612_vm5, %v1609_v9, %v1611_v12  ;;  %v3556_v3 = vpack.c.bf16 %v2092_v63, %v2091_v61  ;;  %v2126_v12 = vld [vmem:[%s4509_s7 + $0x128] sm:$0xff]  ;;  %v2093_v9 = vld [vmem:[%s4509_s7 + $0x20] sm:$0xff]  ;;  %v3574_v61 = vpack.c.bf16 %v2118_v56, %v2117_v55 }
 0x13f   :  { %3346 = vmatprep.subr.msk.mxu1 %vm50_vm6, %v1616_v14  ;;  %v1826_v10 = vpop.permute.xlu0 %1825  ;;  %v3592_v14 = vpack.c.bf16 %v2126_v12, %v2125_v7  ;;  %v2101_v63 = vld [vmem:[%s4509_s7 + $0x60] sm:$0xff]  ;;  %v2119_v7 = vld [vmem:[%s4509_s7 + $0xf0] sm:$0xff] }
 0x140   :  { %v1833_v15 = vsel %vm1831_vm7, %v1824_v11, %v1826_v10  ;;  %3347 = vmatpush1.msk.msra.mxu1 %vm50_vm6, %v1615_v13  ;;  %v2094_v13 = vld [vmem:[%s4509_s7 + $0x28] sm:$0xff]  ;;  %v3576_v1 = vpack.c.bf16 %v2102_v0, %v2101_v63  ;;  %v2135_v12 = vld [vmem:[%s4509_s7 + $0x170] sm:$0xff] }
 0x141   :  { %v1822_v16 = vpop.permute.xlu1 %1821  ;;  %3348 = vmatmul.mubr.msk.f32.vlgmr.msra.gmra.mrb[2].mxu1 %vm150_vm15, %v3341_v6  ;;  %3351 = vmatprep.subr.msk.mxu0 %vm50_vm6, %v1833_v15  ;;  %v2110_v6 = vld [vmem:[%s4509_s7 + $0xa8] sm:$0xff]  ;;  %v2144_v15 = vld [vmem:[%s4509_s7 + $0x1b8] sm:$0xff] }
 0x142   :  { %v1832_v19 = vsel %vm1831_vm7, %v1822_v16, %v1824_v11  ;;  %1982 = vmatprep.mubr.f32.mxu1 %v3708_v2  ;;  %v3558_v11 = vpack.c.bf16 %v2110_v6, %v2109_v5  ;;  %v2111_v16 = vld [vmem:[%s4509_s7 + $0xb0] sm:$0xff] }
 0x143   :  { %3352 = vmatpush1.msk.msra.mxu0 %vm50_vm6, %v1832_v19  ;;  %v1828_v21 = vpop.permute.xlu0 %1827 }
 0x144   :  { %3353 = vmatmul.mubr.msk.f32.vlgmr.msra.gmra.mrb[0].mxu0 %vm150_vm15, %v3349_v8  ;;  %v1834_v24 = vsel %vm1831_vm7, %v1826_v10, %v1828_v21  ;;  %3551 = vmatprep.subr.bf16.mxu0 %v3550_v49  ;;  %v2143_v10 = vld [vmem:[%s4509_s7 + $0x1b0] sm:$0xff]  ;;  %v2132_v49 = vld [vmem:[%s4509_s7 + $0x158] sm:$0xff] }
 0x145   :  { %v1830_v22 = vpop.permute.xlu1 %1829  ;;  %3553 = vmatpush3.bf16.msra.mxu0 %v3552_v54  ;;  %v3594_v19 = vpack.c.bf16 %v2144_v15, %v2143_v10  ;;  %v2150_v54 = vld [vmem:[%s4509_s7 + $0x1e8] sm:$0xff]  ;;  %v3604_v57 = vpack.c.bf16 %v2132_v49, %v2131_v48  ;;  %v2136_v10 = vld [vmem:[%s4509_s7 + $0x178] sm:$0xff]  ;;  %v2103_v15 = vld [vmem:[%s4509_s7 + $0x70] sm:$0xff] }
 0x146   :  { %v1835_v23 = vsel %vm1831_vm7, %v1828_v21, %v1830_v22  ;;  %3555 = vmatprep.subr.bf16.mxu0 %v3554_v59  ;;  %v2112_v21 = vld [vmem:[%s4509_s7 + $0xb8] sm:$0xff]  ;;  %v2127_v22 = vld [vmem:[%s4509_s7 + $0x130] sm:$0xff]  ;;  %v3606_v59 = vpack.c.bf16 %v2150_v54, %v2149_v53  ;;  %v3361_v48 = vld [vmem:[%s4510_s6 + $0x1] ss:$0 sm:$0xff] }
 0x147   :  { %3354 = vmatprep.subr.msk.mxu1 %vm50_vm6, %v1835_v23  ;;  %v2128_v23 = vld [vmem:[%s4509_s7 + $0x138] sm:$0xff]  ;;  %v3375_v49 = vld [vmem:[%s4510_s6 + $0x3] ss:$0 sm:$0xff] }
 0x148   :  { %3355 = vmatpush1.msk.msra.mxu1 %vm50_vm6, %v1834_v24  ;;  %v3562_v24 = vpack.c.bf16 %v2112_v21, %v2111_v16  ;;  %v2104_v16 = vld [vmem:[%s4509_s7 + $0x78] sm:$0xff]  ;;  %vm2300_vm6 = vcmask 1047624  }
 0x149   :  { %3356 = vmatmul.mubr.msk.f32.vlgmr.msra.gmra.mrb[2].mxu1 %vm150_vm15, %v3349_v8  ;;  %3583 = vmatprep.subr.bf16.mxu1 %v3582_v45  ;;  %v3560_v8 = vpack.c.bf16 %v2094_v13, %v2093_v9 }
 0x14a   :  { %3585 = vmatpush3.bf16.msra.mxu1 %v3584_v50  ;;  %3557 = vmatpush3.bf16.msra.mxu0 %v3556_v3  ;;  %v2099_v50 = vld [vmem:[%s4509_s7 + $0x50] sm:$0xff] }
 0x14b   :  { %3587 = vmatprep.subr.bf16.mxu1 %v3586_v58  ;;  %3559 = vmatprep.subr.bf16.mxu0 %v3558_v11  ;;  %v3572_v58 = vpack.c.bf16 %v2100_v52, %v2099_v50  ;;  %v2151_v3 = vld [vmem:[%s4509_s7 + $0x1f0] sm:$0xff]  ;;  %v2120_v11 = vld [vmem:[%s4509_s7 + $0xf8] sm:$0xff]  ;;  %v3387_v50 = vld [vmem:[%s4510_s6 + $0x5] ss:$0 sm:$0xff] }
 0x14e   :  { %3589 = vmatpush3.bf16.msra.mxu1 %v3588_v62  ;;  %3561 = vmatpush3.bf16.msra.mxu0 %v3560_v8  ;;  %v3608_v62 = vpack.c.bf16 %v2134_v18, %v2133_v60  ;;  %v3612_v8 = vpack.c.bf16 %v2136_v10, %v2135_v12  ;;  %v3381_v60 = vld [vmem:[%s4510_s6 + $0x4] ss:$0 sm:$0xff]  ;;  %v3393_v18 = vld [vmem:[%s4510_s6 + $0x6] ss:$0 sm:$0xff] }
 0x14f   :  { %3591 = vmatprep.subr.bf16.mxu1 %v3590_v4  ;;  %3563 = vmatprep.subr.bf16.mxu0 %v3562_v24  ;;  %v2152_v4 = vld [vmem:[%s4509_s7 + $0x1f8] sm:$0xff] }
 0x150   :  { %v3610_v6 = vpack.c.bf16 %v2152_v4, %v2151_v3 }
 0x152   :  { %3593 = vmatpush3.bf16.msra.mxu1 %v3592_v14  ;;  %v3578_v14 = vpack.c.bf16 %v2120_v11, %v2119_v7 }
 0x153   :  { %3595 = vmatprep.subr.bf16.mxu1 %v3594_v19  ;;  %v3580_v19 = vpack.c.bf16 %v2104_v16, %v2103_v15 }
 0x154   :  { %v1997_v2 = vpop.permute.xlu0 %1996 }
 0x1f0   :  { %v819_v25 = vpop.f32.mrb[0].mxu1 }
 0x1f1   :  { %v821_v20 = vpop.f32.mrb[1].mxu1 }
 0x217   :  { %v1913_v26 = vpop.f32.mrb[0].mxu0 }
 0x218   :  { %v3614_v27 = vadd.f32 %v1913_v26, %v819_v25  ;;  %v1915_v28 = vpop.f32.mrb[1].mxu0  ;;  %v2095_v25 = vld [vmem:[%s4509_s7 + $0x30] sm:$0xff]  ;;  %v2145_v26 = vld [vmem:[%s4509_s7 + $0x1c0] sm:$0xff] }
 0x219   :  { %v3615_v29 = vadd.f32 %v1915_v28, %v821_v20  ;;  %v2096_v20 = vld [vmem:[%s4509_s7 + $0x38] sm:$0xff]  ;;  %v2114_v28 = vld [vmem:[%s4509_s7 + $0xc8] sm:$0xff] }
 0x21a   :  { %v1999_v17 = vadd.f32 %v3614_v27, %v1997_v2  ;;  %v2113_v27 = vld [vmem:[%s4509_s7 + $0xc0] sm:$0xff] }
 0x21b   :  { %v2000_v30 = vadd.f32 %v3615_v29, %v1997_v2  ;;  %v3596_v29 = vpack.c.bf16 %v2128_v23, %v2127_v22 }
 0x21c   :  { %v4109_v31 = vmax.f32 %v1999_v17, 0.0  ;;  %v1984_v32 = vpop.f32.mrb[2].mxu1  ;;  %2003 = vst [vmem:[%s4507_s8] sm:$0xff] %v1999_v17  ;;  %v3564_v17 = vpack.c.bf16 %v2096_v20, %v2095_v25 }
 0x21d   :  { %v4114_v33 = vmax.f32 %v2000_v30, 0.0  ;;  %v2001_v34 = vadd.f32 %v1997_v2, %v1984_v32  ;;  %2004 = vst [vmem:[%s4507_s8 + $0x8] sm:$0xff] %v2000_v30  ;;  %v1986_v35 = vpop.f32.mrb[3].mxu1  ;;  %v2129_v32 = vld [vmem:[%s4509_s7 + $0x140] sm:$0xff]  ;;  %3597 = vmatpush3.bf16.msra.mxu1 %v3596_v29 }
 0x21e   :  { %2011 = vst [vmem:[%s4508_s9] sm:$0xff] %v4109_v31  ;;  %v2002_v36 = vadd.f32 %v1997_v2, %v1986_v35  ;;  %2034 = vrot.lane.b32.xlu0 %v4109_v31, %s3717_s0  ;;  %v2146_v2 = vld [vmem:[%s4509_s7 + $0x1c8] sm:$0xff]  ;;  %v2097_v35 = vld [vmem:[%s4509_s7 + $0x40] sm:$0xff]  ;;  %3565 = vmatpush3.bf16.msra.mxu0 %v3564_v17 }
 0x21f   :  { %2005 = vst [vmem:[%s4507_s8 + $0x10] sm:$0xff] %v2001_v34  ;;  %v4128_v37 = vmax.f32 %v2001_v34, 0.0  ;;  %2012 = vst [vmem:[%s4508_s9 + $0x8] sm:$0xff] %v4114_v33  ;;  %v3598_v30 = vpack.c.bf16 %v2146_v2, %v2145_v26  ;;  %v2130_v34 = vld [vmem:[%s4509_s7 + $0x148] sm:$0xff] }
 0x220   :  { %2006 = vst [vmem:[%s4507_s8 + $0x18] sm:$0xff] %v2002_v36  ;;  %v4137_v38 = vmax.f32 %v2002_v36, 0.0  ;;  %v3566_v36 = vpack.c.bf16 %v2114_v28, %v2113_v27  ;;  %v3600_v45 = vpack.c.bf16 %v2130_v34, %v2129_v32 }
 0x221   :  { %2013 = vst [vmem:[%s4508_s9 + $0x10] sm:$0xff] %v4128_v37  ;;  %v3687_v39 = vpack.i.bf16 %v4128_v37, %v4114_v33  ;;  %3599 = vmatprep.subr.bf16.mxu1 %v3598_v30 }
 0x222   :  { %2014 = vst [vmem:[%s4508_s9 + $0x18] sm:$0xff] %v4137_v38  ;;  %v3692_v41 = vpack.i.bf16 %v4149_v40, %v4137_v38  ;;  %3567 = vmatprep.subr.bf16.mxu0 %v3566_v36  ;;  %3601 = vmatpush3.bf16.msra.mxu1 %v3600_v45 }
 0x223   :  { %3688 = vrot.lane.b32.xlu1 %v3687_v39, %s3717_s0  ;;  %v2098_v39 = vld [vmem:[%s4509_s7 + $0x48] sm:$0xff] }
 0x224   :  { %v3568_v46 = vpack.c.bf16 %v2098_v39, %v2097_v35 }
 0x226   :  { %3569 = vmatpush3.bf16.msra.mxu0 %v3568_v46 }
 0x227   :  { %3693 = vrot.lane.b32.xlu1 %v3692_v41, %s3717_s0  ;;  %v2147_v41 = vld [vmem:[%s4509_s7 + $0x1d0] sm:$0xff]  ;;  %3571 = vmatprep.subr.bf16.mxu0 %v3570_v51  ;;  %v3399_v51 = vld [vmem:[%s4510_s6 + $0x7] ss:$0 sm:$0xff] }
 0x228   :  { %v3602_v47 = vpack.c.bf16 %v2148_v42, %v2147_v41 }
 0x22a   :  { %3603 = vmatprep.subr.bf16.mxu1 %v3602_v47  ;;  %3573 = vmatpush3.bf16.msra.mxu0 %v3572_v58 }
 0x22b   :  { %3605 = vmatpush3.bf16.msra.mxu1 %v3604_v57  ;;  %3575 = vmatprep.subr.bf16.mxu0 %v3574_v61 }
 0x22c   :  { %3607 = vmatprep.subr.bf16.mxu1 %v3606_v59  ;;  %v3369_v59 = vld [vmem:[%s4510_s6 + $0x2] ss:$0 sm:$0xff] }
 0x22e   :  { %3577 = vmatpush3.bf16.msra.mxu0 %v3576_v1 }
 0x22f   :  { %3609 = vmatpush3.bf16.msra.mxu1 %v3608_v62  ;;  %3579 = vmatprep.subr.bf16.mxu0 %v3578_v14  ;;  %v3358_v62 = vld [vmem:[%s4512_s4 + $0x10] sm:$0xff] }
 0x230   :  { %3611 = vmatprep.subr.bf16.mxu1 %v3610_v6  ;;  %v3405_v6 = vld [vmem:[%s4510_s6 + $0x8] ss:$0 sm:$0xff] }
 0x232   :  { %3581 = vmatpush3.bf16.msra.mxu0 %v3580_v19 }
 0x233   :  { %3613 = vmatpush3.bf16.msra.mxu1 %v3612_v8 }
 0x290   :  { %v2035_v29 = vpop.permute.xlu0 %2034 }
 0x295   :  { %v3689_v5 = vpop.permute.xlu1 %3688 }
 0x296   :  { %v3691_v9 = vunpack.i.h.bf16 %v3689_v5  ;;  %v3690_v13 = vunpack.i.l.bf16 %v3689_v5 }
 0x298   :  { %v2045_v22 = vsel %vm145_vm14, %v3690_v13, %v3691_v9  ;;  %v2044_v32 = vsel %vm145_vm14, %v2035_v29, %v3690_v13  ;;  %v3359_v29 = vld [vmem:[%s4512_s4 + $0x18] sm:$0xff] }
 0x299   :  { %v3694_v21 = vpop.permute.xlu1 %3693  ;;  %v2058_v28 = vmax.f32 %v4114_v33, %v2045_v22 }
 0x29a   :  { %v3696_v23 = vunpack.i.h.bf16 %v3694_v21  ;;  %v3695_v24 = vunpack.i.l.bf16 %v3694_v21 }
 0x29c   :  { %v2061_v25 = vmax.f32 %v4149_v40, %v3696_v23  ;;  %v2046_v20 = vsel %vm145_vm14, %v3691_v9, %v3695_v24  ;;  %v2047_v26 = vsel %vm145_vm14, %v3695_v24, %v3696_v23  ;;  %v2057_v40 = vmax.f32 %v4109_v31, %v2044_v32 }
 0x29d   :  { %v2054_v2 = vmax.f32 %v4128_v37, %v2046_v20  ;;  %v2060_v27 = vmax.f32 %v4137_v38, %v2047_v26  ;;  %v3357_v26 = vld [vmem:[%s4510_s6] ss:$0 sm:$0xff] }
 0x29f   :  { %v3702_v17 = vpack.i.bf16 %v2061_v25, %v2060_v27  ;;  %v3697_v30 = vpack.i.bf16 %v2054_v2, %v2058_v28 }
 0x2a1   :  { %3703 = vrot.lane.b32.xlu0 %v3702_v17, %s3719_s17  ;;  %3698 = vrot.lane.b32.xlu1 %v3697_v30, %s3719_s17  ;;  %v2305_v30 = vld [vmem:[%s4512_s4] sm:$0xff] }
 0x2a5   :  { %2067 = vrot.lane.b32.xlu1 %v2057_v40, %s3719_s17 }
 0x2a9   :  { %2326 = vrot.lane.b32.xlu1 %v3361_v48, %s3710_s15 }
 0x2ad   :  { %2618 = vrot.lane.b32.xlu1 %v3375_v49, %s3726_s30  ;;  %v3373_v49 = vld [vmem:[%s4512_s4 + $0x38] sm:$0xff] }
 0x2b1   :  { %2832 = vrot.lane.b32.xlu1 %v3387_v50, %s3727_s3 }
 0x2b5   :  { %3045 = vrot.lane.b32.xlu1 %v3399_v51, %s3709_s23  ;;  %v3378_v51 = vld [vmem:[%s4512_s4 + $0x40] sm:$0xff] }
 0x313   :  { %v3704_v34 = vpop.permute.xlu0 %3703  ;;  %v3699_v35 = vpop.permute.xlu1 %3698 }
 0x314   :  { %v3706_v37 = vunpack.i.h.bf16 %v3704_v34  ;;  %v3705_v36 = vunpack.i.l.bf16 %v3704_v34  ;;  %v3701_v38 = vunpack.i.h.bf16 %v3699_v35  ;;  %v3700_v39 = vunpack.i.l.bf16 %v3699_v35 }
 0x316   :  { %v2079_v33 = vsel %vm737_vm1, %v3701_v38, %v3705_v36  ;;  %v2078_v41 = vsel %vm737_vm1, %v3700_v39, %v3701_v38  ;;  %v2080_v42 = vsel %vm737_vm1, %v3705_v36, %v3706_v37  ;;  %v3248_v36 = vld [vmem:[%s4513_s5 + $0x8] sm:$0xff] }
 0x317   :  { %v2087_v43 = vmax.f32 %v2054_v2, %v2079_v33  ;;  %v2068_v44 = vpop.permute.xlu1 %2067  ;;  %v2086_v45 = vmax.f32 %v2058_v28, %v2078_v41  ;;  %v2088_v46 = vmax.f32 %v2060_v27, %v2080_v42  ;;  %v3366_v33 = vld [vmem:[%s4512_s4 + $0x20] sm:$0xff] }
 0x318   :  { %v2077_v31 = vsel %vm737_vm1, %v2068_v44, %v3700_v39  ;;  %v2306_v39 = vld [vmem:[%s4512_s4 + $0x8] sm:$0xff]  ;;  %v3247_v41 = vld [vmem:[%s4513_s5] sm:$0xff] }
 0x319   :  { %v2085_v47 = vmax.f32 %v2057_v40, %v2077_v31  ;;  %2217 = vmatprep.mubr.f32.mxu0 %v2086_v45  ;;  %2287 = vmatprep.mubr.f32.mxu1 %v2088_v46  ;;  %v3367_v45 = vld [vmem:[%s4512_s4 + $0x28] sm:$0xff]  ;;  %v3372_v31 = vld [vmem:[%s4512_s4 + $0x30] sm:$0xff] }
 0x31a   :  { %2288 = vmatmul.mubr.f32.vlgmr.msra.gmra.mrb[4].mxu1 %v2087_v43 }
 0x31b   :  { %2218 = vmatmul.mubr.f32.vlgmr.msra.gmra.mrb[2].mxu0 %v2085_v47  ;;  %v2327_v1 = vpop.permute.xlu1 %2326 }
 0x31c   :  { %3507 = vmatprep.mubr.msk.f32.mxu0 %vm2339_vm9, %v3358_v62 }
 0x31f   :  { %v2619_v11 = vpop.permute.xlu1 %2618 }
 0x323   :  { %v2833_v15 = vpop.permute.xlu1 %2832 }
 0x327   :  { %v3046_v23 = vpop.permute.xlu1 %3045 }
 0x3ed   :  { %v3475_v52 = vpop.f32.mrb[4].mxu1 }
 0x3ee   :  { %v3440_v53 = vpop.f32.mrb[2].mxu0  ;;  %v3476_v54 = vpop.f32.mrb[5].mxu1 }
 0x3ef   :  { %v3477_v55 = vadd.f32 %v3476_v54, %v3475_v52  ;;  %v3441_v56 = vpop.f32.mrb[3].mxu0  ;;  %v3379_v54 = vld [vmem:[%s4512_s4 + $0x48] sm:$0xff] }
 0x3f0   :  { %v3442_v57 = vadd.f32 %v3441_v56, %v3440_v53  ;;  %v3384_v56 = vld [vmem:[%s4512_s4 + $0x50] sm:$0xff] }
 0x3f2   :  { %v2290_v58 = vadd.f32 %v3477_v55, %v3442_v57 }
 0x3f4   :  { %2293 = vst [vmem:[%s4511_s10] sm:$0xff] %v2290_v58  ;;  %2297 = vrot.lane.b32.xlu0 %v2290_v58, %s3728_s24 }
 0x3f8   :  { %2512 = vrot.lane.b32.xlu0 %v3369_v59, %s3711_s16  ;;  %v3385_v59 = vld [vmem:[%s4512_s4 + $0x58] sm:$0xff] }
 0x3fc   :  { %2725 = vrot.lane.b32.xlu0 %v3381_v60, %s3728_s24 }
 0x400   :  { %2939 = vrot.lane.b32.xlu0 %v3393_v18, %s3712_s19  ;;  %v3390_v18 = vld [vmem:[%s4512_s4 + $0x60] sm:$0xff] }
 0x466   :  { %v2298_v61 = vpop.permute.xlu0 %2297 }
 0x467   :  { %2301 = vst.msk [vmem:[#allocation4] sm:$0xff] %vm2300_vm6, %v2298_v61 }
 0x468   :  { %2303 = vst.msk [vmem:[#allocation4 + $0x8] sm:$0xff] %vm2302_vm8, %v2298_v61 }
 0x46a   :  { %v2513_v5 = vpop.permute.xlu0 %2512 }
 0x46e   :  { %v2304_v63 = vld [vmem:[#allocation4] sm:$0xff]  ;;  %v2726_v13 = vpop.permute.xlu0 %2725 }
 0x46f   :  { %v2315_v0 = vld [vmem:[#allocation4 + $0x8] sm:$0xff]  ;;  %v2329_v4 = vmul.f32 %v2327_v1, %v2304_v63  ;;  %v2515_v7 = vmul.f32 %v2513_v5, %v2304_v63  ;;  %v2621_v9 = vmul.f32 %v2619_v11, %v2304_v63  ;;  %v2728_v14 = vmul.f32 %v2726_v13, %v2304_v63 }
 0x470   :  { %v2330_v3 = vmul.f32 %v2327_v1, %v2315_v0  ;;  %v2516_v12 = vmul.f32 %v2513_v5, %v2315_v0  ;;  %v2622_v10 = vmul.f32 %v2619_v11, %v2315_v0  ;;  %v2835_v16 = vmul.f32 %v2833_v15, %v2304_v63  ;;  %v3397_v1 = vld [vmem:[%s4512_s4 + $0x78] sm:$0xff] }
 0x471   :  { %2333 = vrot.lane.b32.xlu0 %v2329_v4, %s3717_s0  ;;  %v2729_v8 = vmul.f32 %v2726_v13, %v2315_v0  ;;  %v2836_v21 = vmul.f32 %v2833_v15, %v2315_v0  ;;  %v3048_v24 = vmul.f32 %v3046_v23, %v2304_v63  ;;  %v3049_v20 = vmul.f32 %v3046_v23, %v2315_v0 }
 0x472   :  { %2335 = vrot.lane.b32.xlu1 %v2330_v3, %s3717_s0  ;;  %s3730_s0 = smov 119   ;;  %v2940_v19 = vpop.permute.xlu0 %2939  ;;  %v2314_v17 = vmul.f32 %v3357_v26, %v2304_v63  ;;  %v3402_v3 = vld [vmem:[%s4512_s4 + $0x80] sm:$0xff] }
 0x473   :  { %v2942_v22 = vmul.f32 %v2940_v19, %v2304_v63  ;;  %v2943_v25 = vmul.f32 %v2940_v19, %v2315_v0 }
 0x475   :  { %3151 = vrot.lane.b32.xlu0 %v3405_v6, %s3713_s27  ;;  %s3731_s27 = smov 118  }
 0x476   :  { %2519 = vrot.lane.b32.xlu1 %v2515_v7, %s3718_s14  ;;  %v3403_v7 = vld [vmem:[%s4512_s4 + $0x88] sm:$0xff] }
 0x479   :  { %2521 = vrot.lane.b32.xlu0 %v2516_v12, %s3718_s14 }
 0x47a   :  { %2625 = vrot.lane.b32.xlu1 %v2621_v9, %s3729_s2 }
 0x47d   :  { %2627 = vrot.lane.b32.xlu0 %v2622_v10, %s3729_s2 }
 0x47e   :  { %2732 = vrot.lane.b32.xlu1 %v2728_v14, %s3730_s0 }
 0x481   :  { %2734 = vrot.lane.b32.xlu0 %v2729_v8, %s3730_s0 }
 0x482   :  { %2839 = vrot.lane.b32.xlu1 %v2835_v16, %s3731_s27 }
 0x485   :  { %2841 = vrot.lane.b32.xlu0 %v2836_v21, %s3731_s27 }
 0x486   :  { %2946 = vrot.lane.b32.xlu1 %v2942_v22, %s3719_s17 }
 0x489   :  { %2948 = vrot.lane.b32.xlu0 %v2943_v25, %s3719_s17 }
 0x48a   :  { %3052 = vrot.lane.b32.xlu1 %v3048_v24, %s3720_s18 }
 0x48d   :  { %3054 = vrot.lane.b32.xlu0 %v3049_v20, %s3720_s18 }
 0x4e3   :  { %v2334_v27 = vpop.permute.xlu0 %2333 }
 0x4e4   :  { %v2336_v2 = vpop.permute.xlu1 %2335 }
 0x4e5   :  { %v2337_v28 = vsel %vm145_vm14, %v2334_v27, %v2336_v2 }
 0x4e6   :  { %3505 = vmatprep.subr.mxu0 %v2337_v28 }
 0x4e7   :  { %3506 = vmatpush3.msra.mxu0 %v2337_v28  ;;  %v3152_v32 = vpop.permute.xlu0 %3151 }
 0x4e8   :  { %3508 = vmatmul.mubr.msk.f32.vlgmr.msra.gmra.mrb[4].mxu0 %vm2339_vm9, %v3359_v29  ;;  %3510 = vmatprep.subr.mxu0 %v2314_v17  ;;  %v3154_v40 = vmul.f32 %v3152_v32, %v2304_v63  ;;  %v3155_v34 = vmul.f32 %v3152_v32, %v2315_v0  ;;  %v2520_v35 = vpop.permute.xlu1 %2519  ;;  %v3391_v63 = vld [vmem:[%s4512_s4 + $0x68] sm:$0xff]  ;;  %v3396_v0 = vld [vmem:[%s4512_s4 + $0x70] sm:$0xff] }
 0x4e9   :  { %3511 = vmatpush3.msra.mxu0 %v2314_v17  ;;  %3512 = vmatprep.mubr.msk.f32.mxu0 %vm2339_vm9, %v2305_v30 }
 0x4ea   :  { %3160 = vrot.lane.b32.xlu0 %v3155_v34, %s3721_s20  ;;  %3158 = vrot.lane.b32.xlu1 %v3154_v40, %s3721_s20 }
 0x4eb   :  { %v2522_v37 = vpop.permute.xlu0 %2521 }
 0x4ec   :  { %v2523_v38 = vsel %vm518_vm0, %v2520_v35, %v2522_v37  ;;  %v2626_v42 = vpop.permute.xlu1 %2625 }
 0x4ed   :  { %3515 = vmatprep.subr.mxu0 %v2523_v38 }
 0x4ee   :  { %3256 = vperm.xlu0 %3686, %v3248_v36   ;;  %3251 = vperm.xlu1 %3707, %v3247_v41  }
 0x4ef   :  { %v2628_v43 = vpop.permute.xlu0 %2627 }
 0x4f0   :  { %3513 = vmatmul.mubr.msk.f32.vlgmr.msra.gmra.mrb[4].mxu0 %vm2339_vm9, %v2306_v39  ;;  %v2630_v44 = vsel %vm2629_vm10, %v2626_v42, %v2628_v43  ;;  %v2733_v47 = vpop.permute.xlu1 %2732 }
 0x4f1   :  { %3516 = vmatpush3.msra.mxu0 %v2523_v38  ;;  %3517 = vmatprep.mubr.msk.f32.mxu0 %vm2339_vm9, %v3366_v33 }
 0x4f2   :  { %3520 = vmatprep.subr.mxu0 %v2630_v44 }
 0x4f3   :  { %v2735_v46 = vpop.permute.xlu0 %2734 }
 0x4f4   :  { %v2737_v48 = vsel %vm2736_vm11, %v2733_v47, %v2735_v46  ;;  %v2840_v52 = vpop.permute.xlu1 %2839 }
 0x4f7   :  { %v2842_v50 = vpop.permute.xlu0 %2841 }
 0x4f8   :  { %3518 = vmatmul.mubr.msk.f32.vlgmr.msra.gmra.mrb[4].mxu0 %vm2339_vm9, %v3367_v45  ;;  %v2844_v53 = vsel %vm2843_vm12, %v2840_v52, %v2842_v50  ;;  %v2947_v57 = vpop.permute.xlu1 %2946 }
 0x4f9   :  { %3521 = vmatpush3.msra.mxu0 %v2630_v44  ;;  %3522 = vmatprep.mubr.msk.f32.mxu0 %vm2339_vm9, %v3372_v31 }
 0x4fa   :  { %3525 = vmatprep.subr.mxu0 %v2737_v48 }
 0x4fb   :  { %v2949_v55 = vpop.permute.xlu0 %2948 }
 0x4fc   :  { %v2950_v58 = vsel %vm737_vm1, %v2947_v57, %v2949_v55  ;;  %v3053_v61 = vpop.permute.xlu1 %3052 }
 0x4ff   :  { %v3055_v60 = vpop.permute.xlu0 %3054 }
 0x500   :  { %3523 = vmatmul.mubr.msk.f32.vlgmr.msra.gmra.mrb[4].mxu0 %vm2339_vm9, %v3373_v49  ;;  %v3056_v62 = vsel %vm955_vm2, %v3053_v61, %v3055_v60 }
 0x501   :  { %3526 = vmatpush3.msra.mxu0 %v2737_v48  ;;  %3527 = vmatprep.mubr.msk.f32.mxu0 %vm2339_vm9, %v3378_v51 }
 0x502   :  { %3530 = vmatprep.subr.mxu0 %v2844_v53 }
 0x508   :  { %3528 = vmatmul.mubr.msk.f32.vlgmr.msra.gmra.mrb[4].mxu0 %vm2339_vm9, %v3379_v54 }
 0x509   :  { %3531 = vmatpush3.msra.mxu0 %v2844_v53  ;;  %3532 = vmatprep.mubr.msk.f32.mxu0 %vm2339_vm9, %v3384_v56 }
 0x50a   :  { %3535 = vmatprep.subr.mxu0 %v2950_v58 }
 0x510   :  { %3533 = vmatmul.mubr.msk.f32.vlgmr.msra.gmra.mrb[4].mxu0 %vm2339_vm9, %v3385_v59 }
 0x511   :  { %3536 = vmatpush3.msra.mxu0 %v2950_v58  ;;  %3537 = vmatprep.mubr.msk.f32.mxu0 %vm2339_vm9, %v3390_v18 }
 0x512   :  { %3540 = vmatprep.subr.mxu0 %v3056_v62 }
 0x518   :  { %3538 = vmatmul.mubr.msk.f32.vlgmr.msra.gmra.mrb[4].mxu0 %vm2339_vm9, %v3391_v63 }
 0x519   :  { %3541 = vmatpush3.msra.mxu0 %v3056_v62  ;;  %3542 = vmatprep.mubr.msk.f32.mxu0 %vm2339_vm9, %v3396_v0 }
 0x520   :  { %3543 = vmatmul.mubr.msk.f32.vlgmr.msra.gmra.mrb[4].mxu0 %vm2339_vm9, %v3397_v1 }
 0x521   :  { %3547 = vmatprep.mubr.msk.f32.mxu0 %vm2339_vm9, %v3402_v3 }
 0x55c   :  { %v3159_v4 = vpop.permute.xlu1 %3158  ;;  %v3161_v5 = vpop.permute.xlu0 %3160 }
 0x55d   :  { %v3162_v6 = vsel %vm1174_vm3, %v3159_v4, %v3161_v5 }
 0x55e   :  { %3545 = vmatprep.subr.mxu0 %v3162_v6 }
 0x55f   :  { %3546 = vmatpush3.msra.mxu0 %v3162_v6 }
 0x560   :  { %3548 = vmatmul.mubr.msk.f32.vlgmr.msra.gmra.mrb[4].mxu0 %vm2339_vm9, %v3403_v7 }
 0x56d   :  { %v3252_v11 = vpop.permute.xlu1 %3251  ;;  %v3257_v12 = vpop.permute.xlu0 %3256 }
 0x633   :  { %v3549_v9 = vpop.f32.mrb[4].mxu0 }
 0x634   :  { %v3260_v13 = vadd.f32 %v3549_v9, %v3257_v12  ;;  %v3236_v14 = vpop.f32.mrb[5].mxu0 }
 0x635   :  { %v3259_v10 = vadd.f32 %v3252_v11, %v3236_v14 }
 0x636   :  { %3262 = vst [vmem:[%s4514_s11 + $0x8] sm:$0xff] %v3260_v13  ;;  %v3264_v15 = vmax.f32 %v3260_v13, 0.0 }
 0x637   :  { %3261 = vst [vmem:[%s4514_s11] sm:$0xff] %v3259_v10  ;;  %v3263_v16 = vmax.f32 %v3259_v10, 0.0 }
 0x638   :  { %3266 = vst [vmem:[%s4515_s12 + $0x8] sm:$0xff] %v3264_v15 }
 0x639   :  { %3265 = vst [vmem:[%s4515_s12] sm:$0xff] %v3263_v16 }

</bundles_post_ra>
